<compile_context>
chip_gen: v7x
topology: tpu7x:2x2x1
jax: 0.10.0
libtpu: 0.0.40
codegen_flags: <defaults>
</compile_context>

<pallas_src>
import jax
import jax.numpy as jnp
from jax.experimental import pallas as pl
from jax.experimental.pallas import tpu as pltpu

IN_FEATURES = 28 * 28          # 784
HIDDEN = 512
OUT_FEATURES = 10
OUT_PADDED = 128               # lane-dense output width (sliced to 10 in wrapper)
TB_MAX = 512                   # max batch-tile rows (v5e sweet spot; amortizes
                               # grid-step overhead on v6e/v7x)


def _round_up(x, m):
    return ((x + m - 1) // m) * m


def _choose_tb(batch):
    """Pick the batch-tile size.

    - enough tiles that tb <= TB_MAX
    - >= 2 tiles once the batch is big enough, so v7x's two TensorCores both
      get work (the batch grid axis is marked "parallel")
    - tb rounded up to 16 rows (bf16 sublane pack); ragged-tile waste stays
      under ~16 rows per tile.  Power-of-two batches land on 128/256/512,
      keeping M a multiple of 256 for full MXU occupancy on v6e/v7x.
    """
    ntiles = max(pl.cdiv(batch, TB_MAX), 2 if batch >= 512 else 1)
    return min(TB_MAX, _round_up(pl.cdiv(batch, ntiles), 16))


def mlp_kernel(x_ref, w1_ref, b1_ref, w2_ref, b2_ref, w3_ref, b3_ref, o_ref):
    # x_ref: (tb, 784) f32 straight from HBM; wK: (in, out) bf16;
    # bK: (1, out) f32; o_ref: (tb, 128) f32.
    # The f32->bf16 cast rides in otherwise-idle VPU slots under the MXU.
    x = x_ref[...].astype(jnp.bfloat16)

    h1 = jnp.dot(x, w1_ref[...], preferred_element_type=jnp.float32) + b1_ref[...]
    h1 = jnp.maximum(h1, 0.0).astype(jnp.bfloat16)

    h2 = jnp.dot(h1, w2_ref[...], preferred_element_type=jnp.float32) + b2_ref[...]
    h2 = jnp.maximum(h2, 0.0).astype(jnp.bfloat16)

    o_ref[...] = jnp.dot(h2, w3_ref[...], preferred_element_type=jnp.float32) + b3_ref[...]


def prepare_params(params):
    """One-time: cast matmul weights to bf16.  Only the 10-wide output layer is
    zero-padded to 128 lanes; K stays at 784 (no 896 pad needed)."""
    w1, b1, w2, b2, w3, b3 = params
    w1p = w1.astype(jnp.bfloat16)                                   # (784, 512)
    w2p = w2.astype(jnp.bfloat16)                                   # (512, 512)
    w3p = jnp.zeros((HIDDEN, OUT_PADDED), jnp.bfloat16).at[:, :OUT_FEATURES].set(
        w3.astype(jnp.bfloat16))                                    # (512, 128)
    b1p = b1.astype(jnp.float32)
    b2p = b2.astype(jnp.float32)
    b3p = jnp.zeros((1, OUT_PADDED), jnp.float32).at[:, :OUT_FEATURES].set(
        b3.astype(jnp.float32))
    return (w1p, b1p, w2p, b2p, w3p, b3p)


@jax.jit
def neural_network_forward(x_nchw, prepared_params):
    """x_nchw: (B, 1, 28, 28) float32. Returns logits (B, 10) float32.

    Note: each distinct B retraces (shape-dependent tile choice).
    """
    w1, b1, w2, b2, w3, b3 = prepared_params
    B = x_nchw.shape[0]

    # nn.Flatten(): (B, 1, 28, 28) -> (B, 784); metadata-only reshape.
    x = x_nchw.reshape(B, IN_FEATURES)

    tb = _choose_tb(B)
    grid = (pl.cdiv(B, tb),)          # ragged last tile: reads padded, writes masked
    const = lambda i: (0, 0)          # weights/biases VMEM-resident across grid steps

    out_padded = pl.pallas_call(
        mlp_kernel,
        out_shape=jax.ShapeDtypeStruct((B, OUT_PADDED), jnp.float32),
        grid=grid,
        in_specs=[
            pl.BlockSpec((tb, IN_FEATURES), lambda i: (i, 0)),   # x tile, raw f32
            pl.BlockSpec((IN_FEATURES, HIDDEN), const),          # w1
            pl.BlockSpec((1, HIDDEN), const),                    # b1
            pl.BlockSpec((HIDDEN, HIDDEN), const),               # w2
            pl.BlockSpec((1, HIDDEN), const),                    # b2
            pl.BlockSpec((HIDDEN, OUT_PADDED), const),           # w3
            pl.BlockSpec((1, OUT_PADDED), const),                # b3
        ],
        out_specs=pl.BlockSpec((tb, OUT_PADDED), lambda i: (i, 0)),
        compiler_params=pltpu.CompilerParams(
            dimension_semantics=("parallel",),    # split batch tiles across TCs (v7x)
            vmem_limit_bytes=32 * 1024 * 1024,    # ~12 MiB used at tb=512
        ),
    )(x, w1, b1, w2, b2, w3, b3)

    return out_padded[:, :OUT_FEATURES]


def init_params(key):
    """Deterministic init matching nn.Linear shapes.

    PyTorch stores Linear weights as (out, in); we store the transpose
    (in, out) so the kernel computes x @ W + b directly.
    """
    k1, k2, k3, k4, k5, k6 = jax.random.split(key, 6)

    def uniform(k, shape, fan_in):
        bound = 1.0 / jnp.sqrt(fan_in)
        return jax.random.uniform(k, shape, jnp.float32, -bound, bound)

    w1 = uniform(k1, (IN_FEATURES, HIDDEN), IN_FEATURES)
    b1 = uniform(k2, (1, HIDDEN), IN_FEATURES)
    w2 = uniform(k3, (HIDDEN, HIDDEN), HIDDEN)
    b2 = uniform(k4, (1, HIDDEN), HIDDEN)
    w3 = uniform(k5, (HIDDEN, OUT_FEATURES), HIDDEN)
    b3 = uniform(k6, (1, OUT_FEATURES), HIDDEN)
    return (w1, b1, w2, b2, w3, b3)


def reference_forward_bf16(x_nchw, params):
    """Reference with the same bf16-input / f32-accumulation numerics as the kernel."""
    w1, b1, w2, b2, w3, b3 = params
    x = x_nchw.reshape(x_nchw.shape[0], IN_FEATURES).astype(jnp.bfloat16)
    h1 = jnp.maximum(
        jnp.dot(x, w1.astype(jnp.bfloat16), preferred_element_type=jnp.float32) + b1, 0.0
    ).astype(jnp.bfloat16)
    h2 = jnp.maximum(
        jnp.dot(h1, w2.astype(jnp.bfloat16), preferred_element_type=jnp.float32) + b2, 0.0
    ).astype(jnp.bfloat16)
    return jnp.dot(h2, w3.astype(jnp.bfloat16), preferred_element_type=jnp.float32) + b3


def reference_forward_f32(x_nchw, params):
    w1, b1, w2, b2, w3, b3 = params
    x = x_nchw.reshape(x_nchw.shape[0], IN_FEATURES)
    h1 = jnp.maximum(x @ w1 + b1, 0.0)
    h2 = jnp.maximum(h1 @ w2 + b2, 0.0)
    return h2 @ w3 + b3


if __name__ == "__main__":
    key = jax.random.PRNGKey(0)
    kx, kp = jax.random.split(key)

    B = 2
    x = jax.random.normal(kx, (B, 1, 28, 28), dtype=jnp.float32)
    params = init_params(kp)
    prepared = prepare_params(params)

    logits = neural_network_forward(x, prepared)
    logits = jax.block_until_ready(logits)

    assert logits.shape == (B, OUT_FEATURES)

    # Tight check against a reference with identical bf16/f32-accum numerics.
    ref_bf16 = reference_forward_bf16(x, params)
    assert jnp.allclose(logits, ref_bf16, atol=2e-3, rtol=2e-3)

    # Loose sanity check against the full-precision forward pass.
    ref_f32 = reference_forward_f32(x, params)
    assert jnp.allclose(logits, ref_f32, atol=5e-2, rtol=5e-2)

    print("KERNEL_OK")
</pallas_src>

<mosaic_0001>
module attributes {stable_mosaic.version = 11 : i64} {
  func.func @mlp_kernel(%arg0: i32, %arg1: memref<16x784xf32, #tpu.memory_space<vmem>>, %arg2: memref<784x512xbf16, #tpu.memory_space<vmem>>, %arg3: memref<1x512xf32, #tpu.memory_space<vmem>>, %arg4: memref<512x512xbf16, #tpu.memory_space<vmem>>, %arg5: memref<1x512xf32, #tpu.memory_space<vmem>>, %arg6: memref<512x128xbf16, #tpu.memory_space<vmem>>, %arg7: memref<1x128xf32, #tpu.memory_space<vmem>>, %arg8: memref<16x128xf32, #tpu.memory_space<vmem>>) attributes {dimension_semantics = [#tpu.dimension_semantics<parallel>], iteration_bounds = array<i64: 1>, scalar_prefetch = 0 : i64, scratch_operands = 0 : i64, tpu.core_type = #tpu.core_type<tc>, window_params = [{transform_indices = @transform_0, window_bounds = array<i64: 16, 784>}, {pipeline_mode = #tpu.pipeline_mode<synchronous>, transform_indices = @transform_1, window_bounds = array<i64: 784, 512>}, {pipeline_mode = #tpu.pipeline_mode<synchronous>, transform_indices = @transform_2, window_bounds = array<i64: 1, 512>}, {pipeline_mode = #tpu.pipeline_mode<synchronous>, transform_indices = @transform_3, window_bounds = array<i64: 512, 512>}, {pipeline_mode = #tpu.pipeline_mode<synchronous>, transform_indices = @transform_4, window_bounds = array<i64: 1, 512>}, {pipeline_mode = #tpu.pipeline_mode<synchronous>, transform_indices = @transform_5, window_bounds = array<i64: 512, 128>}, {pipeline_mode = #tpu.pipeline_mode<synchronous>, transform_indices = @transform_6, window_bounds = array<i64: 1, 128>}, {transform_indices = @transform_7, window_bounds = array<i64: 16, 128>}]} {
    %c0 = arith.constant 0 : index
    %c0_0 = arith.constant 0 : index
    %0 = vector.load %arg1[%c0, %c0_0] : memref<16x784xf32, #tpu.memory_space<vmem>>, vector<16x784xf32>
    %1 = arith.truncf %0 : vector<16x784xf32> to vector<16x784xbf16>
    %c0_1 = arith.constant 0 : index
    %c0_2 = arith.constant 0 : index
    %2 = vector.load %arg2[%c0_1, %c0_2] : memref<784x512xbf16, #tpu.memory_space<vmem>>, vector<784x512xbf16>
    %cst = arith.constant dense<0.000000e+00> : vector<16x512xf32>
    %3 = tpu.matmul %1, %2, %cst {dimension_numbers = #tpu.dot_dimension_numbers<[1], [0], [0], [1], [0, 0, 1, 1], [], []>} : vector<16x784xbf16>, vector<784x512xbf16>, vector<16x512xf32> -> vector<16x512xf32>
    %c0_3 = arith.constant 0 : index
    %c0_4 = arith.constant 0 : index
    %4 = vector.load %arg3[%c0_3, %c0_4] : memref<1x512xf32, #tpu.memory_space<vmem>>, vector<1x512xf32>
    %5 = vector.broadcast %4 : vector<1x512xf32> to vector<16x512xf32>
    %6 = arith.addf %3, %5 : vector<16x512xf32>
    %cst_5 = arith.constant 0.000000e+00 : f32
    %7 = vector.broadcast %cst_5 : f32 to vector<16x512xf32>
    %8 = arith.maximumf %6, %7 : vector<16x512xf32>
    %9 = arith.truncf %8 : vector<16x512xf32> to vector<16x512xbf16>
    %c0_6 = arith.constant 0 : index
    %c0_7 = arith.constant 0 : index
    %10 = vector.load %arg4[%c0_6, %c0_7] : memref<512x512xbf16, #tpu.memory_space<vmem>>, vector<512x512xbf16>
    %cst_8 = arith.constant dense<0.000000e+00> : vector<16x512xf32>
    %11 = tpu.matmul %9, %10, %cst_8 {dimension_numbers = #tpu.dot_dimension_numbers<[1], [0], [0], [1], [0, 0, 1, 1], [], []>} : vector<16x512xbf16>, vector<512x512xbf16>, vector<16x512xf32> -> vector<16x512xf32>
    %c0_9 = arith.constant 0 : index
    %c0_10 = arith.constant 0 : index
    %12 = vector.load %arg5[%c0_9, %c0_10] : memref<1x512xf32, #tpu.memory_space<vmem>>, vector<1x512xf32>
    %13 = vector.broadcast %12 : vector<1x512xf32> to vector<16x512xf32>
    %14 = arith.addf %11, %13 : vector<16x512xf32>
    %cst_11 = arith.constant 0.000000e+00 : f32
    %15 = vector.broadcast %cst_11 : f32 to vector<16x512xf32>
    %16 = arith.maximumf %14, %15 : vector<16x512xf32>
    %17 = arith.truncf %16 : vector<16x512xf32> to vector<16x512xbf16>
    %c0_12 = arith.constant 0 : index
    %c0_13 = arith.constant 0 : index
    %18 = vector.load %arg6[%c0_12, %c0_13] : memref<512x128xbf16, #tpu.memory_space<vmem>>, vector<512x128xbf16>
    %cst_14 = arith.constant dense<0.000000e+00> : vector<16x128xf32>
    %19 = tpu.matmul %17, %18, %cst_14 {dimension_numbers = #tpu.dot_dimension_numbers<[1], [0], [0], [1], [0, 0, 1, 1], [], []>} : vector<16x512xbf16>, vector<512x128xbf16>, vector<16x128xf32> -> vector<16x128xf32>
    %c0_15 = arith.constant 0 : index
    %c0_16 = arith.constant 0 : index
    %20 = vector.load %arg7[%c0_15, %c0_16] : memref<1x128xf32, #tpu.memory_space<vmem>>, vector<1x128xf32>
    %21 = vector.broadcast %20 : vector<1x128xf32> to vector<16x128xf32>
    %22 = arith.addf %19, %21 : vector<16x128xf32>
    %c0_17 = arith.constant 0 : index
    %c0_18 = arith.constant 0 : index
    %23 = vector.load %arg8[%c0_17, %c0_18] : memref<16x128xf32, #tpu.memory_space<vmem>>, vector<16x128xf32>
    tpu.vector_store %arg8[%c0_17, %c0_18], %22 {strides = array<i32>} : memref<16x128xf32, #tpu.memory_space<vmem>>, vector<16x128xf32>,
    return
  }
  func.func @transform_0(%arg0: i32) -> (i32, i32) {
    %c0_i32 = arith.constant 0 : i32
    %c0_i32_0 = arith.constant 0 : i32
    return %arg0, %c0_i32 : i32, i32
  }
  func.func @transform_1(%arg0: i32) -> (i32, i32) {
    %c0_i32 = arith.constant 0 : i32
    %c0_i32_0 = arith.constant 0 : i32
    %c0_i32_1 = arith.constant 0 : i32
    return %c0_i32, %c0_i32_0 : i32, i32
  }
  func.func @transform_2(%arg0: i32) -> (i32, i32) {
    %c0_i32 = arith.constant 0 : i32
    %c0_i32_0 = arith.constant 0 : i32
    %c0_i32_1 = arith.constant 0 : i32
    return %c0_i32, %c0_i32_0 : i32, i32
  }
  func.func @transform_3(%arg0: i32) -> (i32, i32) {
    %c0_i32 = arith.constant 0 : i32
    %c0_i32_0 = arith.constant 0 : i32
    %c0_i32_1 = arith.constant 0 : i32
    return %c0_i32, %c0_i32_0 : i32, i32
  }
  func.func @transform_4(%arg0: i32) -> (i32, i32) {
    %c0_i32 = arith.constant 0 : i32
    %c0_i32_0 = arith.constant 0 : i32
    %c0_i32_1 = arith.constant 0 : i32
    return %c0_i32, %c0_i32_0 : i32, i32
  }
  func.func @transform_5(%arg0: i32) -> (i32, i32) {
    %c0_i32 = arith.constant 0 : i32
    %c0_i32_0 = arith.constant 0 : i32
    %c0_i32_1 = arith.constant 0 : i32
    return %c0_i32, %c0_i32_0 : i32, i32
  }
  func.func @transform_6(%arg0: i32) -> (i32, i32) {
    %c0_i32 = arith.constant 0 : i32
    %c0_i32_0 = arith.constant 0 : i32
    %c0_i32_1 = arith.constant 0 : i32
    return %c0_i32, %c0_i32_0 : i32, i32
  }
  func.func @transform_7(%arg0: i32) -> (i32, i32) {
    %c0_i32 = arith.constant 0 : i32
    %c0_i32_0 = arith.constant 0 : i32
    return %arg0, %c0_i32 : i32, i32
  }
}

</mosaic_0001>

<bundles_post_ra>
// kernel: neural_network_forward.1
= control target key start
LH: loop header
LB: loop body
LE: loop exit
PB: predicated region body
PF: predicated region fallthrough
CT: control target
= control target key end

     0   :  { %12 = vsyncpa [#allocation3], 0  ;;  %s4501_s0 = inlined_call_operand.vmem [shape: f32[2,784], index: 0, kind: input, shape index: {}]   ;;  %s4502_s1 = inlined_call_operand.hbm [shape: bf16[784,512], index: 1, kind: input, shape index: {}]   ;;  %s4503_s2 = inlined_call_operand.vmem [shape: f32[1,512], index: 2, kind: input, shape index: {}]   ;;  %s4504_s3 = inlined_call_operand.hbm [shape: bf16[512,512], index: 3, kind: input, shape index: {}]   ;;  %s4505_s4 = inlined_call_operand.vmem [shape: f32[1,512], index: 4, kind: input, shape index: {}]   ;;  %s4506_s5 = inlined_call_operand.hbm [shape: bf16[512,128], index: 5, kind: input, shape index: {}]   ;;  %s4507_s6 = inlined_call_operand.vmem [shape: f32[1,128], index: 6, kind: input, shape index: {}]   ;;  %s4508_s7 = inlined_call_operand.hbm [shape: f32[2,128], index: 7, kind: output, shape index: {}]  }
   0x1   :  { %13 = vsyncpa [#allocation6], 0 }
   0x2   :  { %14 = vsyncpa [#allocation4], 0  ;;  %s4260_s24 = smov [#allocation5]   ;;  %s4261_s26 = smov [#allocation2]  }
   0x3   :  { %s36_s25 = sshll.u32 %s4260_s24, 4  ;;  %s22_s27 = sshll.u32 %s4261_s26, 4  ;;  %s37_s25 = int_to_ptr.vmem [resolvable:$true] %s36_s25  ;;  %s4312_s27 = int_to_ptr.vmem [resolvable:$true] %s22_s27 }
   0x4   :  { %s4166_s30 = scalar_lea.hbm %s4504_s3, 16384 }
   0x5   :  { %p4167_p0 = scmp.ne.s32.totalorder %s4504_s3, %s4166_s30  ;;  %p4170_p1 = scmp.lt.u32.totalorder %s4166_s30, %s4504_s3 }
   0x7   :  { %p4172_p2 = pnand %p4170_p1, %p4167_p0 }
   0x9   :  { %4175 = shalt.err (!%p4172_p2)
}
   0xa   :  { %s4176_s12 = scalar_lea.vmem %s37_s25, 16384  ;;  %p4181_p4 = scmp.lt.s32.totalorder %s37_s25, %s37_s25 }
   0xb   :  { %p4177_p3 = scmp.ne.s32.totalorder %s37_s25, %s4176_s12  ;;  %p4182_p5 = scmp.lt.s32.totalorder %s4176_s12, %s4176_s12 }
   0xd   :  { %p4183_p6 = por %p4182_p5, %p4181_p4 }
   0xf   :  { %p4184_p7 = pnand %p4183_p6, %p4177_p3 }
  0x11   :  { %4187 = shalt.err (!%p4184_p7)
}
  0x12   :  { %s4262_s13 = smov 256   ;;  %s4263_s14 = smov 16  }
  0x13   :  { %42 = dma.hbm_to_vmem [thread:$0]  %s4504_s3, 16384, %s37_s25, [#allocation6], %s4262_s13, %s4262_s13, %s4263_s14  }
  0x14   :  { %s4188_s19 = scalar_lea.hbm %s4502_s1, 25088 }
  0x15   :  { %p4189_p8 = scmp.ne.s32.totalorder %s4502_s1, %s4188_s19  ;;  %p4192_p9 = scmp.lt.u32.totalorder %s4188_s19, %s4502_s1 }
  0x17   :  { %p4194_p10 = pnand %p4192_p9, %p4189_p8 }
  0x19   :  { %4197 = shalt.err (!%p4194_p10)
}
  0x1a   :  { %s4198_s24 = scalar_lea.vmem %s4312_s27, 25088  ;;  %p4203_p12 = scmp.lt.s32.totalorder %s4312_s27, %s4312_s27 }
  0x1b   :  { %p4199_p11 = scmp.ne.s32.totalorder %s4312_s27, %s4198_s24  ;;  %p4204_p13 = scmp.lt.s32.totalorder %s4198_s24, %s4198_s24 }
  0x1d   :  { %p4205_p0 = por %p4204_p13, %p4203_p12 }
  0x1f   :  { %p4206_p1 = pnand %p4205_p0, %p4199_p11 }
  0x21   :  { %4209 = shalt.err (!%p4206_p1)
}
  0x22   :  { %28 = dma.hbm_to_vmem [thread:$0]  %s4502_s1, 25088, %s4312_s27, [#allocation3], %s4262_s13, %s4262_s13, %s4263_s14  }
  0x23   :  { %s4264_s26 = smov [#allocation7]   ;;  %s4210_s8 = scalar_lea.hbm %s4506_s5, 4096 }
  0x24   :  { %s50_s28 = sshll.u32 %s4264_s26, 4  ;;  %p4211_p2 = scmp.ne.s32.totalorder %s4506_s5, %s4210_s8  ;;  %s51_s28 = int_to_ptr.vmem [resolvable:$true] %s50_s28 }
  0x25   :  { %p4214_p3 = scmp.lt.u32.totalorder %s4210_s8, %s4506_s5 }
  0x27   :  { %p4216_p4 = pnand %p4214_p3, %p4211_p2 }
  0x29   :  { %4219 = shalt.err (!%p4216_p4)
}
  0x2a   :  { %s4220_s15 = scalar_lea.vmem %s51_s28, 4096  ;;  %p4225_p6 = scmp.lt.s32.totalorder %s51_s28, %s51_s28 }
  0x2b   :  { %p4221_p5 = scmp.ne.s32.totalorder %s51_s28, %s4220_s15  ;;  %p4226_p7 = scmp.lt.s32.totalorder %s4220_s15, %s4220_s15 }
  0x2d   :  { %p4227_p8 = por %p4226_p7, %p4225_p6 }
  0x2f   :  { %p4228_p9 = pnand %p4227_p8, %p4221_p5 }
  0x31   :  { %4231 = shalt.err (!%p4228_p9)
}
  0x32   :  { %s4265_s1 = smov 64   ;;  %s4266_s27 = smov 4  }
  0x33   :  { %56 = dma.hbm_to_vmem [thread:$0]  %s4506_s5, 4096, %s51_s28, [#allocation6], %s4265_s1, %s4265_s1, %s4266_s27  }
  0x34   :  { %4254 = dma.done.wait [#allocation3], 25088  }
  0x35   :  { %4255 = vsyncadd [#allocation3], 4294942208 }
  0x36   :  { %4256 = dma.done.wait [#allocation6], 20480  }
  0x37   :  { %4257 = vsyncadd [#allocation6], 4294946816  ;;  %v3624_v0 = vld [vmem:[#allocation2 + $0x4] ss:$16 sps:$4 sm:$0xff]   ;;  %v3626_v1 = vld [vmem:[#allocation2 + $0xc] ss:$16 sps:$4 sm:$0xff]   ;;  %v108_v41 = vlaneseq }
  0x38   :  { %1466 = vmatprep.subr.bf16.mxu0 %v3624_v0  ;;  %v3628_v2 = vld [vmem:[#allocation2] ss:$16 sps:$4 sm:$0xff]   ;;  %v3629_v3 = vld [vmem:[#allocation2 + $0x8] ss:$16 sps:$4 sm:$0xff]   ;;  %1638 = vmatprep.subr.bf16.mxu1 %v3626_v1  ;;  %v3630_v4 = vld [vmem:[#allocation2 + $0x24] ss:$16 sps:$4 sm:$0xff]  }
  0x39   :  { %1467 = vmatpush1.bf16.msra.mxu0 %v3628_v2  ;;  %1639 = vmatpush1.bf16.msra.mxu1 %v3629_v3  ;;  %v3632_v5 = vld [vmem:[#allocation2 + $0x2c] ss:$16 sps:$4 sm:$0xff]   ;;  %v3634_v6 = vld [vmem:[#allocation2 + $0x20] ss:$16 sps:$4 sm:$0xff]   ;;  %v3635_v7 = vld [vmem:[#allocation2 + $0x28] ss:$16 sps:$4 sm:$0xff]  }
  0x3a   :  { %1468 = vmatprep.subr.bf16.mxu0 %v3630_v4  ;;  %1640 = vmatprep.subr.bf16.mxu1 %v3632_v5  ;;  %v3636_v8 = vld [vmem:[#allocation2 + $0x44] ss:$16 sps:$4 sm:$0xff]   ;;  %v3638_v9 = vld [vmem:[#allocation2 + $0x4c] ss:$16 sps:$4 sm:$0xff]   ;;  %v3640_v10 = vld [vmem:[#allocation2 + $0x40] ss:$16 sps:$4 sm:$0xff]  }
  0x3b   :  { %v3641_v11 = vld [vmem:[#allocation2 + $0x48] ss:$16 sps:$4 sm:$0xff]   ;;  %v3642_v12 = vld [vmem:[#allocation2 + $0x64] ss:$16 sps:$4 sm:$0xff]   ;;  %v3644_v13 = vld [vmem:[#allocation2 + $0x6c] ss:$16 sps:$4 sm:$0xff]  }
  0x3c   :  { %v3646_v14 = vld [vmem:[#allocation2 + $0x60] ss:$16 sps:$4 sm:$0xff]   ;;  %v3647_v15 = vld [vmem:[#allocation2 + $0x68] ss:$16 sps:$4 sm:$0xff]   ;;  %v3648_v16 = vld [vmem:[#allocation2 + $0x84] ss:$16 sps:$4 sm:$0xff]  }
  0x3d   :  { %1469 = vmatpush1.bf16.msra.mxu0 %v3634_v6  ;;  %1641 = vmatpush1.bf16.msra.mxu1 %v3635_v7  ;;  %v3650_v17 = vld [vmem:[#allocation2 + $0x8c] ss:$16 sps:$4 sm:$0xff]   ;;  %v3652_v18 = vld [vmem:[#allocation2 + $0x80] ss:$16 sps:$4 sm:$0xff]   ;;  %v3653_v19 = vld [vmem:[#allocation2 + $0x88] ss:$16 sps:$4 sm:$0xff]  }
  0x3e   :  { %1470 = vmatprep.subr.bf16.mxu0 %v3636_v8  ;;  %1642 = vmatprep.subr.bf16.mxu1 %v3638_v9  ;;  %v3654_v20 = vld [vmem:[#allocation2 + $0xa4] ss:$16 sps:$4 sm:$0xff]   ;;  %v3656_v21 = vld [vmem:[#allocation2 + $0xac] ss:$16 sps:$4 sm:$0xff]   ;;  %v3658_v22 = vld [vmem:[#allocation2 + $0xa0] ss:$16 sps:$4 sm:$0xff]  }
  0x3f   :  { %v3659_v23 = vld [vmem:[#allocation2 + $0xa8] ss:$16 sps:$4 sm:$0xff]   ;;  %v3660_v24 = vld [vmem:[#allocation2 + $0xc4] ss:$16 sps:$4 sm:$0xff]   ;;  %v3662_v25 = vld [vmem:[#allocation2 + $0xcc] ss:$16 sps:$4 sm:$0xff]  }
  0x40   :  { %v3664_v26 = vld [vmem:[#allocation2 + $0xc0] ss:$16 sps:$4 sm:$0xff]   ;;  %v3665_v27 = vld [vmem:[#allocation2 + $0xc8] ss:$16 sps:$4 sm:$0xff]   ;;  %v3666_v28 = vld [vmem:[#allocation2 + $0xe4] ss:$16 sps:$4 sm:$0xff]  }
  0x41   :  { %1471 = vmatpush1.bf16.msra.mxu0 %v3640_v10  ;;  %1643 = vmatpush1.bf16.msra.mxu1 %v3641_v11  ;;  %v3668_v29 = vld [vmem:[#allocation2 + $0xec] ss:$16 sps:$4 sm:$0xff]   ;;  %v3670_v30 = vld [vmem:[#allocation2 + $0xe0] ss:$16 sps:$4 sm:$0xff]   ;;  %v3671_v31 = vld [vmem:[#allocation2 + $0xe8] ss:$16 sps:$4 sm:$0xff]  }
  0x42   :  { %1472 = vmatprep.subr.bf16.mxu0 %v3642_v12  ;;  %1644 = vmatprep.subr.bf16.mxu1 %v3644_v13  ;;  %v3672_v32 = vld [vmem:[#allocation2 + $0x104] ss:$16 sps:$4 sm:$0xff]   ;;  %v3674_v33 = vld [vmem:[#allocation2 + $0x10c] ss:$16 sps:$4 sm:$0xff]   ;;  %v3676_v34 = vld [vmem:[#allocation2 + $0x100] ss:$16 sps:$4 sm:$0xff]  }
  0x43   :  { %v3677_v35 = vld [vmem:[#allocation2 + $0x108] ss:$16 sps:$4 sm:$0xff]   ;;  %v3678_v36 = vld [vmem:[#allocation2 + $0x124] ss:$16 sps:$4 sm:$0xff]   ;;  %v3680_v37 = vld [vmem:[#allocation2 + $0x12c] ss:$16 sps:$4 sm:$0xff]  }
  0x44   :  { %v3682_v38 = vld [vmem:[#allocation2 + $0x120] ss:$16 sps:$4 sm:$0xff]   ;;  %v4267_v39 = vmov 1983009808   ;;  %v3683_v42 = vld [vmem:[#allocation2 + $0x128] ss:$16 sps:$4 sm:$0xff]  }
  0x45   :  { %1473 = vmatpush1.bf16.msra.mxu0 %v3646_v14  ;;  %1645 = vmatpush1.bf16.msra.mxu1 %v3647_v15  ;;  %v106_v40 = vunpack.c.l.s4 %v4267_v39  ;;  %v3684_v43 = vld [vmem:[#allocation2 + $0x144] ss:$16 sps:$4 sm:$0xff]   ;;  %v3686_v44 = vld [vmem:[#allocation2 + $0x14c] ss:$16 sps:$4 sm:$0xff]   ;;  %v3688_v45 = vld [vmem:[#allocation2 + $0x140] ss:$16 sps:$4 sm:$0xff]  }
  0x46   :  { %1474 = vmatprep.subr.bf16.mxu0 %v3648_v16  ;;  %1646 = vmatprep.subr.bf16.mxu1 %v3650_v17  ;;  %v3689_v46 = vld [vmem:[#allocation2 + $0x148] ss:$16 sps:$4 sm:$0xff]   ;;  %v4355_v48 = vshrl.u32 %v108_v41, 7  ;;  %v3690_v49 = vld [vmem:[#allocation2 + $0x164] ss:$16 sps:$4 sm:$0xff]   ;;  %vm1462_vm0 = vcmask 130048  }
  0x47   :  { %v107_v47 = vunpack.c.0.s8 %v106_v40  ;;  %v3692_v50 = vld [vmem:[#allocation2 + $0x16c] ss:$16 sps:$4 sm:$0xff]   ;;  %v3694_v51 = vld [vmem:[#allocation2 + $0x160] ss:$16 sps:$4 sm:$0xff]   ;;  %v3695_v52 = vld [vmem:[#allocation2 + $0x168] ss:$16 sps:$4 sm:$0xff]  }
  0x48   :  { %v3696_v53 = vld [vmem:[#allocation2 + $0x184] ss:$16 sps:$4 sm:$0xff]   ;;  %v3698_v55 = vld [vmem:[#allocation2 + $0x18c] ss:$16 sps:$4 sm:$0xff]   ;;  %v3700_v59 = vld [vmem:[#allocation2 + $0x180] ss:$16 sps:$4 sm:$0xff]  }
  0x49   :  { %1475 = vmatpush1.bf16.msra.mxu0 %v3652_v18  ;;  %1647 = vmatpush1.bf16.msra.mxu1 %v3653_v19  ;;  %v4358_v54 = vsub.s32 %v107_v47, %v4355_v48  ;;  %v3720_v56 = vld [vmem:[%s4501_s0] ss:$14 sps:$4 sm:$0xff]   ;;  %v3723_v57 = vld [vmem:[%s4501_s0 + $0x1c] ss:$14 sps:$4 sm:$0xff]   ;;  %v3726_v58 = vld [vmem:[%s4501_s0 + $0x38] ss:$14 sps:$4 sm:$0xff]  }
  0x4a   :  { %1476 = vmatprep.subr.bf16.mxu0 %v3654_v20  ;;  %1648 = vmatprep.subr.bf16.mxu1 %v3656_v21  ;;  %v3701_v60 = vld [vmem:[#allocation2 + $0x188] ss:$16 sps:$4 sm:$0xff]   ;;  %v3729_v62 = vld [vmem:[%s4501_s0 + $0x54] ss:$14 sps:$4 sm:$0xff]   ;;  %v3704_v2 = vld [vmem:[#allocation2 + $0x1ac] ss:$16 sps:$4 sm:$0xff]  }
  0x4b   :  { %v111_v61 = vrot.slane %v3720_v56, %v4358_v54  ;;  %v3702_v63 = vld [vmem:[#allocation2 + $0x1a4] ss:$16 sps:$4 sm:$0xff]   ;;  %v125_v0 = vrot.slane %v3723_v57, %v4358_v54  ;;  %v182_v1 = vrot.slane %v3726_v58, %v4358_v54  ;;  %v196_v3 = vrot.slane %v3729_v62, %v4358_v54  ;;  %v3706_v4 = vld [vmem:[#allocation2 + $0x1a0] ss:$16 sps:$4 sm:$0xff]   ;;  %v3707_v5 = vld [vmem:[#allocation2 + $0x1a8] ss:$16 sps:$4 sm:$0xff]  }
  0x4c   :  { %v3708_v7 = vld [vmem:[#allocation2 + $0x1c4] ss:$16 sps:$4 sm:$0xff]   ;;  %v3710_v8 = vld [vmem:[#allocation2 + $0x1cc] ss:$16 sps:$4 sm:$0xff]   ;;  %v3712_v15 = vld [vmem:[#allocation2 + $0x1c0] ss:$16 sps:$4 sm:$0xff]  }
  0x4d   :  { %1477 = vmatpush1.bf16.msra.mxu0 %v3658_v22  ;;  %1649 = vmatpush1.bf16.msra.mxu1 %v3659_v23  ;;  %v134_v6 = vcombine.high %v111_v61, %v125_v0  ;;  %v205_v9 = vcombine.high %v182_v1, %v196_v3  ;;  %v3722_v10 = vld [vmem:[%s4501_s0 + $0x4] ss:$14 sps:$4 sm:$0xff]   ;;  %v3725_v11 = vld [vmem:[%s4501_s0 + $0x20] ss:$14 sps:$4 sm:$0xff]   ;;  %v3728_v13 = vld [vmem:[%s4501_s0 + $0x3c] ss:$14 sps:$4 sm:$0xff]  }
  0x4e   :  { %1478 = vmatprep.subr.bf16.mxu0 %v3660_v24  ;;  %1650 = vmatprep.subr.bf16.mxu1 %v3662_v25  ;;  %v3731_v14 = vld [vmem:[%s4501_s0 + $0x58] ss:$14 sps:$4 sm:$0xff]   ;;  %v3716_v18 = vld [vmem:[#allocation2 + $0x1ec] ss:$16 sps:$4 sm:$0xff]   ;;  %v4389_v19 = vrot.slane %v3722_v10, %v4358_v54  ;;  %v4392_v20 = vrot.slane %v3725_v11, %v4358_v54  ;;  %v4395_v21 = vrot.slane %v3728_v13, %v4358_v54  ;;  %v3718_v23 = vld [vmem:[#allocation2 + $0x1e0] ss:$16 sps:$4 sm:$0xff]  }
  0x4f   :  { %v258_v12 = vpack.c.bf16 %v205_v9, %v134_v6  ;;  %v3713_v16 = vld [vmem:[#allocation2 + $0x1c8] ss:$16 sps:$4 sm:$0xff]   ;;  %v3714_v17 = vld [vmem:[#allocation2 + $0x1e4] ss:$16 sps:$4 sm:$0xff]   ;;  %v4398_v22 = vrot.slane %v3731_v14, %v4358_v54  ;;  %v133_v25 = vcombine.low %v111_v61, %v125_v0  ;;  %v3749_v40 = vld [vmem:[#allocation2 + $0x24c] ss:$16 sps:$4 sm:$0xff]  }
  0x50   :  { %v3719_v24 = vld [vmem:[#allocation2 + $0x1e8] ss:$16 sps:$4 sm:$0xff]   ;;  %v3746_v39 = vld [vmem:[#allocation2 + $0x244] ss:$16 sps:$4 sm:$0xff]   ;;  %v3744_v41 = vld [vmem:[#allocation2 + $0x240] ss:$16 sps:$4 sm:$0xff]  }
  0x51   :  { %1479 = vmatpush1.bf16.msra.mxu0 %v3664_v26  ;;  %1651 = vmatpush1.bf16.msra.mxu1 %v3665_v27  ;;  %v204_v26 = vcombine.low %v182_v1, %v196_v3  ;;  %v3734_v27 = vld [vmem:[#allocation2 + $0x204] ss:$16 sps:$4 sm:$0xff]   ;;  %v3765_v56 = vld [vmem:[#allocation2 + $0x2a8] ss:$16 sps:$4 sm:$0xff]   ;;  %v3773_v58 = vld [vmem:[#allocation2 + $0x2cc] ss:$16 sps:$4 sm:$0xff]  }
  0x52   :  { %1480 = vmatprep.subr.bf16.mxu0 %v3666_v28  ;;  %1652 = vmatprep.subr.bf16.mxu1 %v3668_v29  ;;  %v3737_v28 = vld [vmem:[#allocation2 + $0x20c] ss:$16 sps:$4 sm:$0xff]   ;;  %v136_v29 = vcombine.high %v4389_v19, %v4392_v20  ;;  %v3758_v47 = vld [vmem:[#allocation2 + $0x284] ss:$16 sps:$4 sm:$0xff]   ;;  %v3777_v0 = vld [vmem:[#allocation2 + $0x2e8] ss:$16 sps:$4 sm:$0xff]  }
  0x53   :  { %1498 = vmatprep.mubr.bf16.mxu0 %v258_v12  ;;  %1670 = vmatprep.mubr.bf16.mxu1 %v258_v12  ;;  %v3770_v57 = vld [vmem:[#allocation2 + $0x2c4] ss:$16 sps:$4 sm:$0xff]   ;;  %v3779_v62 = vld [vmem:[#allocation2 + $0x2ec] ss:$16 sps:$4 sm:$0xff]   ;;  %v3780_v3 = vld [vmem:[#allocation2 + $0x300] ss:$16 sps:$4 sm:$0xff]  }
  0x54   :  { %v3776_v61 = vld [vmem:[#allocation2 + $0x2e4] ss:$16 sps:$4 sm:$0xff]   ;;  %v3791_v6 = vld [vmem:[#allocation2 + $0x32c] ss:$16 sps:$4 sm:$0xff]   ;;  %v3792_v11 = vld [vmem:[#allocation2 + $0x340] ss:$16 sps:$4 sm:$0xff]  }
  0x55   :  { %1481 = vmatpush1.bf16.msra.mxu0 %v3670_v30  ;;  %1653 = vmatpush1.bf16.msra.mxu1 %v3671_v31  ;;  %v207_v30 = vcombine.high %v4395_v21, %v4398_v22  ;;  %v3732_v31 = vld [vmem:[#allocation2 + $0x200] ss:$16 sps:$4 sm:$0xff]   ;;  %v3782_v1 = vld [vmem:[#allocation2 + $0x304] ss:$16 sps:$4 sm:$0xff]   ;;  %v3797_v10 = vld [vmem:[#allocation2 + $0x34c] ss:$16 sps:$4 sm:$0xff]  }
  0x56   :  { %1482 = vmatprep.subr.bf16.mxu0 %v3672_v32  ;;  %1654 = vmatprep.subr.bf16.mxu1 %v3674_v33  ;;  %v3735_v32 = vld [vmem:[#allocation2 + $0x208] ss:$16 sps:$4 sm:$0xff]   ;;  %v257_v33 = vpack.c.bf16 %v204_v26, %v133_v25  ;;  %v3794_v9 = vld [vmem:[#allocation2 + $0x344] ss:$16 sps:$4 sm:$0xff]   ;;  %v3803_v14 = vld [vmem:[#allocation2 + $0x36c] ss:$16 sps:$4 sm:$0xff]  }
  0x57   :  { %v3795_v12 = vld [vmem:[#allocation2 + $0x348] ss:$16 sps:$4 sm:$0xff]   ;;  %v3800_v13 = vld [vmem:[#allocation2 + $0x364] ss:$16 sps:$4 sm:$0xff]   ;;  %v3815_v26 = vld [vmem:[#allocation2 + $0x3ac] ss:$16 sps:$4 sm:$0xff]  }
  0x58   :  { %v3812_v25 = vld [vmem:[#allocation2 + $0x3a4] ss:$16 sps:$4 sm:$0xff]  }
  0x59   :  { %1483 = vmatpush1.bf16.msra.mxu0 %v3676_v34  ;;  %1655 = vmatpush1.bf16.msra.mxu1 %v3677_v35  ;;  %v3740_v34 = vld [vmem:[#allocation2 + $0x224] ss:$16 sps:$4 sm:$0xff]   ;;  %v3743_v35 = vld [vmem:[#allocation2 + $0x22c] ss:$16 sps:$4 sm:$0xff]  }
  0x5a   :  { %1484 = vmatprep.subr.bf16.mxu0 %v3678_v36  ;;  %1656 = vmatprep.subr.bf16.mxu1 %v3680_v37  ;;  %v260_v36 = vpack.c.bf16 %v207_v30, %v136_v29  ;;  %v3738_v37 = vld [vmem:[#allocation2 + $0x220] ss:$16 sps:$4 sm:$0xff]   ;;  %v3818_v29 = vld [vmem:[#allocation2 + $0x3c4] ss:$16 sps:$4 sm:$0xff]   ;;  %v3821_v30 = vld [vmem:[#allocation2 + $0x3cc] ss:$16 sps:$4 sm:$0xff]  }
  0x5d   :  { %1485 = vmatpush1.bf16.msra.mxu0 %v3682_v38  ;;  %1657 = vmatpush1.bf16.msra.mxu1 %v3683_v42  ;;  %v3741_v38 = vld [vmem:[#allocation2 + $0x228] ss:$16 sps:$4 sm:$0xff]  }
  0x5e   :  { %1486 = vmatprep.subr.bf16.mxu0 %v3684_v43  ;;  %1658 = vmatprep.subr.bf16.mxu1 %v3686_v44  ;;  %v3747_v42 = vld [vmem:[#allocation2 + $0x248] ss:$16 sps:$4 sm:$0xff]   ;;  %v3752_v43 = vld [vmem:[#allocation2 + $0x264] ss:$16 sps:$4 sm:$0xff]   ;;  %v3755_v44 = vld [vmem:[#allocation2 + $0x26c] ss:$16 sps:$4 sm:$0xff]  }
  0x61   :  { %1487 = vmatpush1.bf16.msra.mxu0 %v3688_v45  ;;  %1659 = vmatpush1.bf16.msra.mxu1 %v3689_v46  ;;  %v3750_v45 = vld [vmem:[#allocation2 + $0x260] ss:$16 sps:$4 sm:$0xff]   ;;  %v3753_v46 = vld [vmem:[#allocation2 + $0x268] ss:$16 sps:$4 sm:$0xff]  }
  0x62   :  { %1488 = vmatprep.subr.bf16.mxu0 %v3690_v49  ;;  %1660 = vmatprep.subr.bf16.mxu1 %v3692_v50  ;;  %v3761_v49 = vld [vmem:[#allocation2 + $0x28c] ss:$16 sps:$4 sm:$0xff]   ;;  %v3756_v50 = vld [vmem:[#allocation2 + $0x280] ss:$16 sps:$4 sm:$0xff]  }
  0x65   :  { %1489 = vmatpush1.bf16.msra.mxu0 %v3694_v51  ;;  %1661 = vmatpush1.bf16.msra.mxu1 %v3695_v52  ;;  %v3759_v51 = vld [vmem:[#allocation2 + $0x288] ss:$16 sps:$4 sm:$0xff]   ;;  %v3764_v52 = vld [vmem:[#allocation2 + $0x2a4] ss:$16 sps:$4 sm:$0xff]  }
  0x66   :  { %1490 = vmatprep.subr.bf16.mxu0 %v3696_v53  ;;  %1662 = vmatprep.subr.bf16.mxu1 %v3698_v55  ;;  %v3767_v53 = vld [vmem:[#allocation2 + $0x2ac] ss:$16 sps:$4 sm:$0xff]   ;;  %v3762_v55 = vld [vmem:[#allocation2 + $0x2a0] ss:$16 sps:$4 sm:$0xff]  }
  0x69   :  { %1491 = vmatpush1.bf16.msra.mxu0 %v3700_v59  ;;  %1663 = vmatpush1.bf16.msra.mxu1 %v3701_v60  ;;  %v3768_v59 = vld [vmem:[#allocation2 + $0x2c0] ss:$16 sps:$4 sm:$0xff]   ;;  %v3771_v60 = vld [vmem:[#allocation2 + $0x2c8] ss:$16 sps:$4 sm:$0xff]  }
  0x6a   :  { %1492 = vmatprep.subr.bf16.mxu0 %v3702_v63  ;;  %1664 = vmatprep.subr.bf16.mxu1 %v3704_v2  ;;  %v3774_v63 = vld [vmem:[#allocation2 + $0x2e0] ss:$16 sps:$4 sm:$0xff]   ;;  %v3785_v2 = vld [vmem:[#allocation2 + $0x30c] ss:$16 sps:$4 sm:$0xff]  }
  0x6d   :  { %1493 = vmatpush1.bf16.msra.mxu0 %v3706_v4  ;;  %1665 = vmatpush1.bf16.msra.mxu1 %v3707_v5  ;;  %v3783_v4 = vld [vmem:[#allocation2 + $0x308] ss:$16 sps:$4 sm:$0xff]   ;;  %v3788_v5 = vld [vmem:[#allocation2 + $0x324] ss:$16 sps:$4 sm:$0xff]  }
  0x6e   :  { %1494 = vmatprep.subr.bf16.mxu0 %v3708_v7  ;;  %1666 = vmatprep.subr.bf16.mxu1 %v3710_v8  ;;  %v3786_v7 = vld [vmem:[#allocation2 + $0x320] ss:$16 sps:$4 sm:$0xff]   ;;  %v3789_v8 = vld [vmem:[#allocation2 + $0x328] ss:$16 sps:$4 sm:$0xff]  }
  0x71   :  { %1495 = vmatpush1.bf16.msra.mxu0 %v3712_v15  ;;  %1667 = vmatpush1.bf16.msra.mxu1 %v3713_v16  ;;  %v3798_v15 = vld [vmem:[#allocation2 + $0x360] ss:$16 sps:$4 sm:$0xff]   ;;  %v3801_v16 = vld [vmem:[#allocation2 + $0x368] ss:$16 sps:$4 sm:$0xff]  }
  0x72   :  { %1496 = vmatprep.subr.bf16.mxu0 %v3714_v17  ;;  %1668 = vmatprep.subr.bf16.mxu1 %v3716_v18  ;;  %v3806_v17 = vld [vmem:[#allocation2 + $0x384] ss:$16 sps:$4 sm:$0xff]   ;;  %v3809_v18 = vld [vmem:[#allocation2 + $0x38c] ss:$16 sps:$4 sm:$0xff]  }
  0x75   :  { %1497 = vmatpush1.bf16.msra.mxu0 %v3718_v23  ;;  %1669 = vmatpush1.bf16.msra.mxu1 %v3719_v24  ;;  %v3804_v23 = vld [vmem:[#allocation2 + $0x380] ss:$16 sps:$4 sm:$0xff]   ;;  %v3807_v24 = vld [vmem:[#allocation2 + $0x388] ss:$16 sps:$4 sm:$0xff]  }
  0x76   :  { %1509 = vmatprep.subr.bf16.mxu0 %v3734_v27  ;;  %1681 = vmatprep.subr.bf16.mxu1 %v3737_v28  ;;  %v3810_v27 = vld [vmem:[#allocation2 + $0x3a0] ss:$16 sps:$4 sm:$0xff]   ;;  %v3813_v28 = vld [vmem:[#allocation2 + $0x3a8] ss:$16 sps:$4 sm:$0xff]  }
  0x78   :  { %1499 = vmatmul.mubr.bf16.vlgmr.msra.gmra.mrb[0].mxu0 %v257_v33  ;;  %1671 = vmatmul.mubr.bf16.vlgmr.msra.gmra.mrb[0].mxu1 %v257_v33  ;;  %v3824_v33 = vld [vmem:[#allocation2 + $0x3e4] ss:$16 sps:$4 sm:$0xff]  }
  0x79   :  { %1510 = vmatpush1.bf16.msra.mxu0 %v3732_v31  ;;  %1682 = vmatpush1.bf16.msra.mxu1 %v3735_v32  ;;  %v3816_v31 = vld [vmem:[#allocation2 + $0x3c0] ss:$16 sps:$4 sm:$0xff]   ;;  %v3819_v32 = vld [vmem:[#allocation2 + $0x3c8] ss:$16 sps:$4 sm:$0xff]  }
  0x7a   :  { %1511 = vmatprep.subr.bf16.mxu0 %v3740_v34  ;;  %1683 = vmatprep.subr.bf16.mxu1 %v3743_v35  ;;  %v3827_v34 = vld [vmem:[#allocation2 + $0x3ec] ss:$16 sps:$4 sm:$0xff]   ;;  %v3822_v35 = vld [vmem:[#allocation2 + $0x3e0] ss:$16 sps:$4 sm:$0xff]  }
  0x7b   :  { %1541 = vmatprep.mubr.bf16.mxu0 %v260_v36  ;;  %1713 = vmatprep.mubr.bf16.mxu1 %v260_v36  ;;  %v3825_v36 = vld [vmem:[#allocation2 + $0x3e8] ss:$16 sps:$4 sm:$0xff]  }
  0x7d   :  { %1512 = vmatpush1.bf16.msra.mxu0 %v3738_v37  ;;  %1684 = vmatpush1.bf16.msra.mxu1 %v3741_v38  ;;  %v135_v37 = vcombine.low %v4389_v19, %v4392_v20  ;;  %v206_v38 = vcombine.low %v4395_v21, %v4398_v22  ;;  %v3834_v19 = vld [vmem:[#allocation2 + $0x420] ss:$16 sps:$4 sm:$0xff]   ;;  %v3837_v20 = vld [vmem:[#allocation2 + $0x428] ss:$16 sps:$4 sm:$0xff]   ;;  %v3842_v21 = vld [vmem:[#allocation2 + $0x444] ss:$16 sps:$4 sm:$0xff]  }
  0x7e   :  { %1513 = vmatprep.subr.bf16.mxu0 %v3746_v39  ;;  %1685 = vmatprep.subr.bf16.mxu1 %v3749_v40  ;;  %v3830_v39 = vld [vmem:[#allocation2 + $0x404] ss:$16 sps:$4 sm:$0xff]   ;;  %v3833_v40 = vld [vmem:[#allocation2 + $0x40c] ss:$16 sps:$4 sm:$0xff]  }
  0x7f   :  { %v3845_v22 = vld [vmem:[#allocation2 + $0x44c] ss:$16 sps:$4 sm:$0xff]  }
  0x81   :  { %1514 = vmatpush1.bf16.msra.mxu0 %v3744_v41  ;;  %1686 = vmatpush1.bf16.msra.mxu1 %v3747_v42  ;;  %v3828_v41 = vld [vmem:[#allocation2 + $0x400] ss:$16 sps:$4 sm:$0xff]   ;;  %v3831_v42 = vld [vmem:[#allocation2 + $0x408] ss:$16 sps:$4 sm:$0xff]  }
  0x82   :  { %1515 = vmatprep.subr.bf16.mxu0 %v3752_v43  ;;  %1687 = vmatprep.subr.bf16.mxu1 %v3755_v44  ;;  %v259_v43 = vpack.c.bf16 %v206_v38, %v135_v37  ;;  %v3836_v44 = vld [vmem:[#allocation2 + $0x424] ss:$16 sps:$4 sm:$0xff]   ;;  %v3905_v38 = vld [vmem:[#allocation2 + $0x58c] ss:$16 sps:$4 sm:$0xff]  }
  0x83   :  { %v3902_v37 = vld [vmem:[#allocation2 + $0x584] ss:$16 sps:$4 sm:$0xff]  }
  0x85   :  { %1516 = vmatpush1.bf16.msra.mxu0 %v3750_v45  ;;  %1688 = vmatpush1.bf16.msra.mxu1 %v3753_v46  ;;  %v3839_v45 = vld [vmem:[#allocation2 + $0x42c] ss:$16 sps:$4 sm:$0xff]   ;;  %v3840_v46 = vld [vmem:[#allocation2 + $0x440] ss:$16 sps:$4 sm:$0xff]  }
  0x86   :  { %1517 = vmatprep.subr.bf16.mxu0 %v3758_v47  ;;  %1689 = vmatprep.subr.bf16.mxu1 %v3761_v49  ;;  %v3843_v47 = vld [vmem:[#allocation2 + $0x448] ss:$16 sps:$4 sm:$0xff]   ;;  %v3848_v49 = vld [vmem:[#allocation2 + $0x464] ss:$16 sps:$4 sm:$0xff]  }
  0x89   :  { %1518 = vmatpush1.bf16.msra.mxu0 %v3756_v50  ;;  %1690 = vmatpush1.bf16.msra.mxu1 %v3759_v51  ;;  %v3924_v50 = vld [vmem:[%s4501_s0 + $0x8] ss:$14 sps:$4 sm:$0xff]   ;;  %v3851_v51 = vld [vmem:[#allocation2 + $0x46c] ss:$16 sps:$4 sm:$0xff]  }
  0x8a   :  { %1519 = vmatprep.subr.bf16.mxu0 %v3764_v52  ;;  %1691 = vmatprep.subr.bf16.mxu1 %v3767_v53  ;;  %v3927_v52 = vld [vmem:[%s4501_s0 + $0x24] ss:$14 sps:$4 sm:$0xff]   ;;  %v4415_v53 = vrot.slane %v3924_v50, %v4358_v54 }
  0x8d   :  { %1520 = vmatpush1.bf16.msra.mxu0 %v3762_v55  ;;  %1692 = vmatpush1.bf16.msra.mxu1 %v3765_v56  ;;  %v3930_v55 = vld [vmem:[%s4501_s0 + $0x40] ss:$14 sps:$4 sm:$0xff]   ;;  %v4421_v56 = vrot.slane %v3927_v52, %v4358_v54  ;;  %v3938_v52 = vld [vmem:[#allocation2 + $0x604] ss:$16 sps:$4 sm:$0xff]  }
  0x8e   :  { %1521 = vmatprep.subr.bf16.mxu0 %v3770_v57  ;;  %1693 = vmatprep.subr.bf16.mxu1 %v3773_v58  ;;  %v3933_v57 = vld [vmem:[%s4501_s0 + $0x5c] ss:$14 sps:$4 sm:$0xff]   ;;  %v3846_v58 = vld [vmem:[#allocation2 + $0x460] ss:$16 sps:$4 sm:$0xff]  }
  0x8f   :  { %v169_v50 = vcombine.low %v4415_v53, %v4421_v56 }
  0x91   :  { %1522 = vmatpush1.bf16.msra.mxu0 %v3768_v59  ;;  %1694 = vmatpush1.bf16.msra.mxu1 %v3771_v60  ;;  %v3849_v59 = vld [vmem:[#allocation2 + $0x468] ss:$16 sps:$4 sm:$0xff]   ;;  %v3854_v60 = vld [vmem:[#allocation2 + $0x484] ss:$16 sps:$4 sm:$0xff]  }
  0x92   :  { %1523 = vmatprep.subr.bf16.mxu0 %v3776_v61  ;;  %1695 = vmatprep.subr.bf16.mxu1 %v3779_v62  ;;  %v4427_v61 = vrot.slane %v3930_v55, %v4358_v54  ;;  %v3857_v62 = vld [vmem:[#allocation2 + $0x48c] ss:$16 sps:$4 sm:$0xff]  }
  0x93   :  { %v3941_v55 = vld [vmem:[#allocation2 + $0x60c] ss:$16 sps:$4 sm:$0xff]  }
  0x95   :  { %1524 = vmatpush1.bf16.msra.mxu0 %v3774_v63  ;;  %1696 = vmatpush1.bf16.msra.mxu1 %v3777_v0  ;;  %v170_v63 = vcombine.high %v4415_v53, %v4421_v56  ;;  %v4432_v0 = vrot.slane %v3933_v57, %v4358_v54  ;;  %v3926_v57 = vld [vmem:[%s4501_s0 + $0xc] ss:$14 sps:$4 sm:$0x33]   ;;  %v3932_v53 = vld [vmem:[%s4501_s0 + $0x44] ss:$14 sps:$4 sm:$0x33]  }
  0x96   :  { %1525 = vmatprep.subr.bf16.mxu0 %v3782_v1  ;;  %1697 = vmatprep.subr.bf16.mxu1 %v3785_v2  ;;  %v3852_v1 = vld [vmem:[#allocation2 + $0x480] ss:$16 sps:$4 sm:$0xff]   ;;  %v3855_v2 = vld [vmem:[#allocation2 + $0x488] ss:$16 sps:$4 sm:$0xff]  }
  0x97   :  { %v3935_v56 = vld [vmem:[%s4501_s0 + $0x60] ss:$14 sps:$4 sm:$0x33]  }
  0x99   :  { %1526 = vmatpush1.bf16.msra.mxu0 %v3780_v3  ;;  %1698 = vmatpush1.bf16.msra.mxu1 %v3783_v4  ;;  %v241_v3 = vcombine.high %v4427_v61, %v4432_v0  ;;  %v3860_v4 = vld [vmem:[#allocation2 + $0x4a4] ss:$16 sps:$4 sm:$0xff]  }
  0x9a   :  { %1527 = vmatprep.subr.bf16.mxu0 %v3788_v5  ;;  %1699 = vmatprep.subr.bf16.mxu1 %v3791_v6  ;;  %v3863_v5 = vld [vmem:[#allocation2 + $0x4ac] ss:$16 sps:$4 sm:$0xff]  }
  0x9b   :  { %v262_v6 = vpack.c.bf16 %v241_v3, %v170_v63  ;;  %v3947_v63 = vld [vmem:[#allocation5 + $0xc] ss:$16 sps:$4 sm:$0xff]   ;;  %v239_v3 = vrot.slane %v3935_v56, %v4358_v54  ;;  %v4017_v56 = vld [vmem:[#allocation5 + $0x188] ss:$16 sps:$4 sm:$0xff]  }
  0x9d   :  { %1528 = vmatpush1.bf16.msra.mxu0 %v3786_v7  ;;  %1700 = vmatpush1.bf16.msra.mxu1 %v3789_v8  ;;  %v3858_v7 = vld [vmem:[#allocation2 + $0x4a0] ss:$16 sps:$4 sm:$0xff]   ;;  %v3861_v8 = vld [vmem:[#allocation2 + $0x4a8] ss:$16 sps:$4 sm:$0xff]  }
  0x9e   :  { %1529 = vmatprep.subr.bf16.mxu0 %v3794_v9  ;;  %1701 = vmatprep.subr.bf16.mxu1 %v3797_v10  ;;  %v3866_v9 = vld [vmem:[#allocation2 + $0x4c4] ss:$16 sps:$4 sm:$0xff]   ;;  %v3869_v10 = vld [vmem:[#allocation2 + $0x4cc] ss:$16 sps:$4 sm:$0xff]  }
  0xa1   :  { %1530 = vmatpush1.bf16.msra.mxu0 %v3792_v11  ;;  %1702 = vmatpush1.bf16.msra.mxu1 %v3795_v12  ;;  %v3864_v11 = vld [vmem:[#allocation2 + $0x4c0] ss:$16 sps:$4 sm:$0xff]   ;;  %v3867_v12 = vld [vmem:[#allocation2 + $0x4c8] ss:$16 sps:$4 sm:$0xff]  }
  0xa2   :  { %1531 = vmatprep.subr.bf16.mxu0 %v3800_v13  ;;  %1703 = vmatprep.subr.bf16.mxu1 %v3803_v14  ;;  %v3872_v13 = vld [vmem:[#allocation2 + $0x4e4] ss:$16 sps:$4 sm:$0xff]   ;;  %v3875_v14 = vld [vmem:[#allocation2 + $0x4ec] ss:$16 sps:$4 sm:$0xff]  }
  0xa5   :  { %1532 = vmatpush1.bf16.msra.mxu0 %v3798_v15  ;;  %1704 = vmatpush1.bf16.msra.mxu1 %v3801_v16  ;;  %v3870_v15 = vld [vmem:[#allocation2 + $0x4e0] ss:$16 sps:$4 sm:$0xff]   ;;  %v3873_v16 = vld [vmem:[#allocation2 + $0x4e8] ss:$16 sps:$4 sm:$0xff]  }
  0xa6   :  { %1533 = vmatprep.subr.bf16.mxu0 %v3806_v17  ;;  %1705 = vmatprep.subr.bf16.mxu1 %v3809_v18  ;;  %v3878_v17 = vld [vmem:[#allocation2 + $0x504] ss:$16 sps:$4 sm:$0xff]   ;;  %v3881_v18 = vld [vmem:[#allocation2 + $0x50c] ss:$16 sps:$4 sm:$0xff]  }
  0xa9   :  { %1534 = vmatpush1.bf16.msra.mxu0 %v3804_v23  ;;  %1706 = vmatpush1.bf16.msra.mxu1 %v3807_v24  ;;  %v3876_v23 = vld [vmem:[#allocation2 + $0x500] ss:$16 sps:$4 sm:$0xff]   ;;  %v3879_v24 = vld [vmem:[#allocation2 + $0x508] ss:$16 sps:$4 sm:$0xff]  }
  0xaa   :  { %1535 = vmatprep.subr.bf16.mxu0 %v3812_v25  ;;  %1707 = vmatprep.subr.bf16.mxu1 %v3815_v26  ;;  %v3884_v25 = vld [vmem:[#allocation2 + $0x524] ss:$16 sps:$4 sm:$0xff]   ;;  %v3887_v26 = vld [vmem:[#allocation2 + $0x52c] ss:$16 sps:$4 sm:$0xff]  }
  0xad   :  { %1536 = vmatpush1.bf16.msra.mxu0 %v3810_v27  ;;  %1708 = vmatpush1.bf16.msra.mxu1 %v3813_v28  ;;  %v3882_v27 = vld [vmem:[#allocation2 + $0x520] ss:$16 sps:$4 sm:$0xff]   ;;  %v3885_v28 = vld [vmem:[#allocation2 + $0x528] ss:$16 sps:$4 sm:$0xff]  }
  0xae   :  { %1537 = vmatprep.subr.bf16.mxu0 %v3818_v29  ;;  %1709 = vmatprep.subr.bf16.mxu1 %v3821_v30  ;;  %v3890_v29 = vld [vmem:[#allocation2 + $0x544] ss:$16 sps:$4 sm:$0xff]   ;;  %v3893_v30 = vld [vmem:[#allocation2 + $0x54c] ss:$16 sps:$4 sm:$0xff]  }
  0xb1   :  { %1538 = vmatpush1.bf16.msra.mxu0 %v3816_v31  ;;  %1710 = vmatpush1.bf16.msra.mxu1 %v3819_v32  ;;  %v3888_v31 = vld [vmem:[#allocation2 + $0x540] ss:$16 sps:$4 sm:$0xff]   ;;  %v3891_v32 = vld [vmem:[#allocation2 + $0x548] ss:$16 sps:$4 sm:$0xff]  }
  0xb2   :  { %1539 = vmatprep.subr.bf16.mxu0 %v3824_v33  ;;  %1711 = vmatprep.subr.bf16.mxu1 %v3827_v34  ;;  %v3896_v33 = vld [vmem:[#allocation2 + $0x564] ss:$16 sps:$4 sm:$0xff]   ;;  %v3899_v34 = vld [vmem:[#allocation2 + $0x56c] ss:$16 sps:$4 sm:$0xff]  }
  0xb5   :  { %1540 = vmatpush1.bf16.msra.mxu0 %v3822_v35  ;;  %1712 = vmatpush1.bf16.msra.mxu1 %v3825_v36  ;;  %v3894_v35 = vld [vmem:[#allocation2 + $0x560] ss:$16 sps:$4 sm:$0xff]   ;;  %v3897_v36 = vld [vmem:[#allocation2 + $0x568] ss:$16 sps:$4 sm:$0xff]  }
  0xb6   :  { %1552 = vmatprep.subr.bf16.mxu0 %v3830_v39  ;;  %1724 = vmatprep.subr.bf16.mxu1 %v3833_v40  ;;  %v3900_v39 = vld [vmem:[#allocation2 + $0x580] ss:$16 sps:$4 sm:$0xff]   ;;  %v3903_v40 = vld [vmem:[#allocation2 + $0x588] ss:$16 sps:$4 sm:$0xff]  }
  0xb8   :  { %1542 = vmatmul.mubr.bf16.vlgmr.msra.gmra.mrb[0].mxu0 %v259_v43  ;;  %1714 = vmatmul.mubr.bf16.vlgmr.msra.gmra.mrb[0].mxu1 %v259_v43  ;;  %v3906_v43 = vld [vmem:[#allocation2 + $0x5a0] ss:$16 sps:$4 sm:$0xff]  }
  0xb9   :  { %1553 = vmatpush1.bf16.msra.mxu0 %v3828_v41  ;;  %1725 = vmatpush1.bf16.msra.mxu1 %v3831_v42  ;;  %v3908_v41 = vld [vmem:[#allocation2 + $0x5a4] ss:$16 sps:$4 sm:$0xff]   ;;  %v3911_v42 = vld [vmem:[#allocation2 + $0x5ac] ss:$16 sps:$4 sm:$0xff]  }
  0xba   :  { %1554 = vmatprep.subr.bf16.mxu0 %v3836_v44  ;;  %1726 = vmatprep.subr.bf16.mxu1 %v3839_v45  ;;  %v3909_v44 = vld [vmem:[#allocation2 + $0x5a8] ss:$16 sps:$4 sm:$0xff]   ;;  %v3914_v45 = vld [vmem:[#allocation2 + $0x5c4] ss:$16 sps:$4 sm:$0xff]  }
  0xbb   :  { %1584 = vmatprep.mubr.bf16.mxu0 %v262_v6  ;;  %1756 = vmatprep.mubr.bf16.mxu1 %v262_v6 }
  0xbd   :  { %1555 = vmatpush1.bf16.msra.mxu0 %v3834_v19  ;;  %1727 = vmatpush1.bf16.msra.mxu1 %v3837_v20  ;;  %v3917_v19 = vld [vmem:[#allocation2 + $0x5cc] ss:$16 sps:$4 sm:$0xff]   ;;  %v3912_v20 = vld [vmem:[#allocation2 + $0x5c0] ss:$16 sps:$4 sm:$0xff]  }
  0xbe   :  { %1556 = vmatprep.subr.bf16.mxu0 %v3842_v21  ;;  %1728 = vmatprep.subr.bf16.mxu1 %v3845_v22  ;;  %v3915_v21 = vld [vmem:[#allocation2 + $0x5c8] ss:$16 sps:$4 sm:$0xff]   ;;  %v3920_v22 = vld [vmem:[#allocation2 + $0x5e4] ss:$16 sps:$4 sm:$0xff]  }
  0xc1   :  { %1557 = vmatpush1.bf16.msra.mxu0 %v3840_v46  ;;  %1729 = vmatpush1.bf16.msra.mxu1 %v3843_v47  ;;  %v3923_v46 = vld [vmem:[#allocation2 + $0x5ec] ss:$16 sps:$4 sm:$0xff]   ;;  %v3918_v47 = vld [vmem:[#allocation2 + $0x5e0] ss:$16 sps:$4 sm:$0xff]  }
  0xc2   :  { %1558 = vmatprep.subr.bf16.mxu0 %v3848_v49  ;;  %1730 = vmatprep.subr.bf16.mxu1 %v3851_v51  ;;  %v3921_v49 = vld [vmem:[#allocation2 + $0x5e8] ss:$16 sps:$4 sm:$0xff]   ;;  %v240_v51 = vcombine.low %v4427_v61, %v4432_v0  ;;  %v154_v0 = vrot.slane %v3926_v57, %v4358_v54  ;;  %v4016_v57 = vld [vmem:[#allocation5 + $0x184] ss:$16 sps:$4 sm:$0xff]  }
  0xc4   :  { %v261_v61 = vpack.c.bf16 %v240_v51, %v169_v50  ;;  %v4010_v50 = vld [vmem:[#allocation5 + $0x164] ss:$16 sps:$4 sm:$0xff]   ;;  %v4013_v51 = vld [vmem:[#allocation5 + $0x16c] ss:$16 sps:$4 sm:$0xff]  }
  0xc5   :  { %1559 = vmatpush1.bf16.msra.mxu0 %v3846_v58  ;;  %1731 = vmatpush1.bf16.msra.mxu1 %v3849_v59  ;;  %v3929_v58 = vld [vmem:[%s4501_s0 + $0x28] ss:$14 sps:$4 sm:$0x33]   ;;  %v3936_v59 = vld [vmem:[#allocation2 + $0x600] ss:$16 sps:$4 sm:$0xff]  }
  0xc6   :  { %1560 = vmatprep.subr.bf16.mxu0 %v3854_v60  ;;  %1732 = vmatprep.subr.bf16.mxu1 %v3857_v62  ;;  %v3939_v60 = vld [vmem:[#allocation2 + $0x608] ss:$16 sps:$4 sm:$0xff]   ;;  %v3944_v62 = vld [vmem:[#allocation5 + $0x4] ss:$16 sps:$4 sm:$0xff]  }
  0xc9   :  { %1561 = vmatpush1.bf16.msra.mxu0 %v3852_v1  ;;  %1733 = vmatpush1.bf16.msra.mxu1 %v3855_v2  ;;  %v168_v1 = vrot.slane %v3929_v58, %v4358_v54  ;;  %v225_v2 = vrot.slane %v3932_v53, %v4358_v54  ;;  %v3956_v54 = vld [vmem:[#allocation5 + $0x44] ss:$16 sps:$4 sm:$0xff]   ;;  %v4019_v58 = vld [vmem:[#allocation5 + $0x18c] ss:$16 sps:$4 sm:$0xff]   ;;  %v4014_v53 = vld [vmem:[#allocation5 + $0x180] ss:$16 sps:$4 sm:$0xff]  }
  0xca   :  { %1562 = vmatprep.subr.bf16.mxu0 %v3860_v4  ;;  %1734 = vmatprep.subr.bf16.mxu1 %v3863_v5  ;;  %v4268_v4 = vmov 0  }
  0xcb   :  { %v171_v5 = vcombine.low %v154_v0, %v168_v1  ;;  %v242_v6 = vcombine.low %v225_v2, %v239_v3  ;;  %v4031_v0 = vld [vmem:[#allocation5 + $0x1cc] ss:$16 sps:$4 sm:$0xff]   ;;  %v4026_v1 = vld [vmem:[#allocation5 + $0x1c0] ss:$16 sps:$4 sm:$0xff]   ;;  %v4029_v2 = vld [vmem:[#allocation5 + $0x1c8] ss:$16 sps:$4 sm:$0xff]  }
  0xcc   :  { %v4034_v3 = vld [vmem:[#allocation5 + $0x1e4] ss:$16 sps:$4 sm:$0xff]  }
  0xcd   :  { %1563 = vmatpush1.bf16.msra.mxu0 %v3858_v7  ;;  %1735 = vmatpush1.bf16.msra.mxu1 %v3861_v8  ;;  %v3942_v7 = vld [vmem:[#allocation5] ss:$16 sps:$4 sm:$0xff]   ;;  %v3945_v8 = vld [vmem:[#allocation5 + $0x8] ss:$16 sps:$4 sm:$0xff]  }
  0xce   :  { %1564 = vmatprep.subr.bf16.mxu0 %v3866_v9  ;;  %1736 = vmatprep.subr.bf16.mxu1 %v3869_v10  ;;  %v263_v9 = vpack.c.bf16 %v242_v6, %v171_v5  ;;  %v3950_v10 = vld [vmem:[#allocation5 + $0x24] ss:$16 sps:$4 sm:$0xff]   ;;  %v4032_v5 = vld [vmem:[#allocation5 + $0x1e0] ss:$16 sps:$4 sm:$0xff]   ;;  %v4035_v6 = vld [vmem:[#allocation5 + $0x1e8] ss:$16 sps:$4 sm:$0xff]  }
  0xd1   :  { %1565 = vmatpush1.bf16.msra.mxu0 %v3864_v11  ;;  %1737 = vmatpush1.bf16.msra.mxu1 %v3867_v12  ;;  %v3953_v11 = vld [vmem:[#allocation5 + $0x2c] ss:$16 sps:$4 sm:$0xff]   ;;  %v3948_v12 = vld [vmem:[#allocation5 + $0x20] ss:$16 sps:$4 sm:$0xff]  }
  0xd2   :  { %1566 = vmatprep.subr.bf16.mxu0 %v3872_v13  ;;  %1738 = vmatprep.subr.bf16.mxu1 %v3875_v14  ;;  %v3951_v13 = vld [vmem:[#allocation5 + $0x28] ss:$16 sps:$4 sm:$0xff]   ;;  %v3959_v14 = vld [vmem:[#allocation5 + $0x4c] ss:$16 sps:$4 sm:$0xff]  }
  0xd5   :  { %1567 = vmatpush1.bf16.msra.mxu0 %v3870_v15  ;;  %1739 = vmatpush1.bf16.msra.mxu1 %v3873_v16  ;;  %v3954_v15 = vld [vmem:[#allocation5 + $0x40] ss:$16 sps:$4 sm:$0xff]   ;;  %v3957_v16 = vld [vmem:[#allocation5 + $0x48] ss:$16 sps:$4 sm:$0xff]  }
  0xd6   :  { %1568 = vmatprep.subr.bf16.mxu0 %v3878_v17  ;;  %1740 = vmatprep.subr.bf16.mxu1 %v3881_v18  ;;  %v3962_v17 = vld [vmem:[#allocation5 + $0x64] ss:$16 sps:$4 sm:$0xff]   ;;  %v3965_v18 = vld [vmem:[#allocation5 + $0x6c] ss:$16 sps:$4 sm:$0xff]  }
  0xd9   :  { %1569 = vmatpush1.bf16.msra.mxu0 %v3876_v23  ;;  %1741 = vmatpush1.bf16.msra.mxu1 %v3879_v24  ;;  %v3960_v23 = vld [vmem:[#allocation5 + $0x60] ss:$16 sps:$4 sm:$0xff]   ;;  %v3963_v24 = vld [vmem:[#allocation5 + $0x68] ss:$16 sps:$4 sm:$0xff]  }
  0xda   :  { %1570 = vmatprep.subr.bf16.mxu0 %v3884_v25  ;;  %1742 = vmatprep.subr.bf16.mxu1 %v3887_v26  ;;  %v3968_v25 = vld [vmem:[#allocation5 + $0x84] ss:$16 sps:$4 sm:$0xff]   ;;  %v3971_v26 = vld [vmem:[#allocation5 + $0x8c] ss:$16 sps:$4 sm:$0xff]  }
  0xdd   :  { %1571 = vmatpush1.bf16.msra.mxu0 %v3882_v27  ;;  %1743 = vmatpush1.bf16.msra.mxu1 %v3885_v28  ;;  %v3966_v27 = vld [vmem:[#allocation5 + $0x80] ss:$16 sps:$4 sm:$0xff]   ;;  %v3969_v28 = vld [vmem:[#allocation5 + $0x88] ss:$16 sps:$4 sm:$0xff]  }
  0xde   :  { %1572 = vmatprep.subr.bf16.mxu0 %v3890_v29  ;;  %1744 = vmatprep.subr.bf16.mxu1 %v3893_v30  ;;  %v3974_v29 = vld [vmem:[#allocation5 + $0xa4] ss:$16 sps:$4 sm:$0xff]   ;;  %v3977_v30 = vld [vmem:[#allocation5 + $0xac] ss:$16 sps:$4 sm:$0xff]  }
  0xe1   :  { %1573 = vmatpush1.bf16.msra.mxu0 %v3888_v31  ;;  %1745 = vmatpush1.bf16.msra.mxu1 %v3891_v32  ;;  %v3972_v31 = vld [vmem:[#allocation5 + $0xa0] ss:$16 sps:$4 sm:$0xff]   ;;  %v3975_v32 = vld [vmem:[#allocation5 + $0xa8] ss:$16 sps:$4 sm:$0xff]  }
  0xe2   :  { %1574 = vmatprep.subr.bf16.mxu0 %v3896_v33  ;;  %1746 = vmatprep.subr.bf16.mxu1 %v3899_v34  ;;  %v3980_v33 = vld [vmem:[#allocation5 + $0xc4] ss:$16 sps:$4 sm:$0xff]   ;;  %v3983_v34 = vld [vmem:[#allocation5 + $0xcc] ss:$16 sps:$4 sm:$0xff]  }
  0xe5   :  { %1575 = vmatpush1.bf16.msra.mxu0 %v3894_v35  ;;  %1747 = vmatpush1.bf16.msra.mxu1 %v3897_v36  ;;  %v3978_v35 = vld [vmem:[#allocation5 + $0xc0] ss:$16 sps:$4 sm:$0xff]   ;;  %v3981_v36 = vld [vmem:[#allocation5 + $0xc8] ss:$16 sps:$4 sm:$0xff]  }
  0xe6   :  { %1576 = vmatprep.subr.bf16.mxu0 %v3902_v37  ;;  %1748 = vmatprep.subr.bf16.mxu1 %v3905_v38  ;;  %v3986_v37 = vld [vmem:[#allocation5 + $0xe4] ss:$16 sps:$4 sm:$0xff]   ;;  %v3989_v38 = vld [vmem:[#allocation5 + $0xec] ss:$16 sps:$4 sm:$0xff]  }
  0xe9   :  { %1577 = vmatpush1.bf16.msra.mxu0 %v3900_v39  ;;  %1749 = vmatpush1.bf16.msra.mxu1 %v3903_v40  ;;  %v3984_v39 = vld [vmem:[#allocation5 + $0xe0] ss:$16 sps:$4 sm:$0xff]   ;;  %v3987_v40 = vld [vmem:[#allocation5 + $0xe8] ss:$16 sps:$4 sm:$0xff]  }
  0xea   :  { %1578 = vmatprep.subr.bf16.mxu0 %v3908_v41  ;;  %1750 = vmatprep.subr.bf16.mxu1 %v3911_v42  ;;  %v3992_v41 = vld [vmem:[#allocation5 + $0x104] ss:$16 sps:$4 sm:$0xff]   ;;  %v3995_v42 = vld [vmem:[#allocation5 + $0x10c] ss:$16 sps:$4 sm:$0xff]  }
  0xed   :  { %1579 = vmatpush1.bf16.msra.mxu0 %v3906_v43  ;;  %1751 = vmatpush1.bf16.msra.mxu1 %v3909_v44  ;;  %v3990_v43 = vld [vmem:[#allocation5 + $0x100] ss:$16 sps:$4 sm:$0xff]   ;;  %v3993_v44 = vld [vmem:[#allocation5 + $0x108] ss:$16 sps:$4 sm:$0xff]  }
  0xee   :  { %1580 = vmatprep.subr.bf16.mxu0 %v3914_v45  ;;  %1752 = vmatprep.subr.bf16.mxu1 %v3917_v19  ;;  %v3998_v45 = vld [vmem:[#allocation5 + $0x124] ss:$16 sps:$4 sm:$0xff]   ;;  %v4001_v19 = vld [vmem:[#allocation5 + $0x12c] ss:$16 sps:$4 sm:$0xff]  }
  0xf1   :  { %1581 = vmatpush1.bf16.msra.mxu0 %v3912_v20  ;;  %1753 = vmatpush1.bf16.msra.mxu1 %v3915_v21  ;;  %v3996_v20 = vld [vmem:[#allocation5 + $0x120] ss:$16 sps:$4 sm:$0xff]   ;;  %v3999_v21 = vld [vmem:[#allocation5 + $0x128] ss:$16 sps:$4 sm:$0xff]  }
  0xf2   :  { %1582 = vmatprep.subr.bf16.mxu0 %v3920_v22  ;;  %1754 = vmatprep.subr.bf16.mxu1 %v3923_v46  ;;  %v4004_v22 = vld [vmem:[#allocation5 + $0x144] ss:$16 sps:$4 sm:$0xff]   ;;  %v4007_v46 = vld [vmem:[#allocation5 + $0x14c] ss:$16 sps:$4 sm:$0xff]  }
  0xf5   :  { %1583 = vmatpush1.bf16.msra.mxu0 %v3918_v47  ;;  %1755 = vmatpush1.bf16.msra.mxu1 %v3921_v49  ;;  %v4002_v47 = vld [vmem:[#allocation5 + $0x140] ss:$16 sps:$4 sm:$0xff]   ;;  %v4005_v49 = vld [vmem:[#allocation5 + $0x148] ss:$16 sps:$4 sm:$0xff]  }
  0xf6   :  { %1595 = vmatprep.subr.bf16.mxu0 %v3938_v52  ;;  %1767 = vmatprep.subr.bf16.mxu1 %v3941_v55  ;;  %v4008_v52 = vld [vmem:[#allocation5 + $0x160] ss:$16 sps:$4 sm:$0xff]   ;;  %v4011_v55 = vld [vmem:[#allocation5 + $0x168] ss:$16 sps:$4 sm:$0xff]  }
  0xf8   :  { %1585 = vmatmul.mubr.bf16.vlgmr.msra.gmra.mrb[0].mxu0 %v261_v61  ;;  %1757 = vmatmul.mubr.bf16.vlgmr.msra.gmra.mrb[0].mxu1 %v261_v61  ;;  %v4020_v61 = vld [vmem:[#allocation5 + $0x1a0] ss:$16 sps:$4 sm:$0xff]  }
  0xf9   :  { %1596 = vmatpush1.bf16.msra.mxu0 %v3936_v59  ;;  %1768 = vmatpush1.bf16.msra.mxu1 %v3939_v60  ;;  %v4022_v59 = vld [vmem:[#allocation5 + $0x1a4] ss:$16 sps:$4 sm:$0xff]   ;;  %v4025_v60 = vld [vmem:[#allocation5 + $0x1ac] ss:$16 sps:$4 sm:$0xff]  }
  0xfa   :  { %1627 = vmatprep.mubr.bf16.mxu0 %v4268_v4  ;;  %1799 = vmatprep.mubr.bf16.mxu1 %v4268_v4  ;;  %v4037_v4 = vld [vmem:[#allocation5 + $0x1ec] ss:$16 sps:$4 sm:$0xff]  }
  0xfb   :  { %2612 = vmatprep.subr.bf16.mxu0 %v3944_v62  ;;  %2698 = vmatprep.subr.bf16.mxu1 %v3947_v63  ;;  %v4023_v62 = vld [vmem:[#allocation5 + $0x1a8] ss:$16 sps:$4 sm:$0xff]   ;;  %v4028_v63 = vld [vmem:[#allocation5 + $0x1c4] ss:$16 sps:$4 sm:$0xff]  }
 0x104   :  { %3357 = vmatmul.mubr.msk.bf16.vlgmr.msra.gmra.mrb[0].mxu0 %vm1462_vm0, %v263_v9  ;;  %3358 = vmatmul.mubr.msk.bf16.vlgmr.msra.gmra.mrb[0].mxu1 %vm1462_vm0, %v263_v9  ;;  %v464_v9 = vsub.s32 0, %v4355_v48 }
 0x105   :  { %2613 = vmatpush1.bf16.msra.mxu0 %v3942_v7  ;;  %2699 = vmatpush1.bf16.msra.mxu1 %v3945_v8  ;;  %v4040_v7 = vld [vmem:[#allocation5 + $0x204] ss:$16 sps:$4 sm:$0xff]   ;;  %v4043_v8 = vld [vmem:[#allocation5 + $0x20c] ss:$16 sps:$4 sm:$0xff]  }
 0x106   :  { %2614 = vmatprep.subr.bf16.mxu0 %v3950_v10  ;;  %2700 = vmatprep.subr.bf16.mxu1 %v3953_v11  ;;  %v472_v10 = vsub.s32 2, %v4355_v48  ;;  %v460_v11 = vld [vmem:[%s4503_s2] sm:$0xf] }
 0x109   :  { %2615 = vmatpush1.bf16.msra.mxu0 %v3948_v12  ;;  %2701 = vmatpush1.bf16.msra.mxu1 %v3951_v13  ;;  %v468_v12 = vsub.s32 1, %v4355_v48  ;;  %v476_v13 = vsub.s32 3, %v4355_v48 }
 0x10a   :  { %2616 = vmatprep.subr.bf16.mxu0 %v3956_v54  ;;  %2702 = vmatprep.subr.bf16.mxu1 %v3959_v14  ;;  %v465_v54 = vrot.slane %v460_v11, %v464_v9  ;;  %v473_v14 = vrot.slane %v460_v11, %v472_v10 }
 0x10d   :  { %2617 = vmatpush1.bf16.msra.mxu0 %v3954_v15  ;;  %2703 = vmatpush1.bf16.msra.mxu1 %v3957_v16  ;;  %v469_v15 = vrot.slane %v460_v11, %v468_v12  ;;  %v477_v16 = vrot.slane %v460_v11, %v476_v13  ;;  %v4082_v11 = vld [vmem:[#allocation5 + $0x2e4] ss:$16 sps:$4 sm:$0xff]  }
 0x10e   :  { %2618 = vmatprep.subr.bf16.mxu0 %v3962_v17  ;;  %2704 = vmatprep.subr.bf16.mxu1 %v3965_v18 }
 0x111   :  { %2619 = vmatpush1.bf16.msra.mxu0 %v3960_v23  ;;  %2705 = vmatpush1.bf16.msra.mxu1 %v3963_v24 }
 0x112   :  { %2620 = vmatprep.subr.bf16.mxu0 %v3968_v25  ;;  %2706 = vmatprep.subr.bf16.mxu1 %v3971_v26 }
 0x115   :  { %2621 = vmatpush1.bf16.msra.mxu0 %v3966_v27  ;;  %2707 = vmatpush1.bf16.msra.mxu1 %v3969_v28 }
 0x116   :  { %2622 = vmatprep.subr.bf16.mxu0 %v3974_v29  ;;  %2708 = vmatprep.subr.bf16.mxu1 %v3977_v30 }
 0x119   :  { %2623 = vmatpush1.bf16.msra.mxu0 %v3972_v31  ;;  %2709 = vmatpush1.bf16.msra.mxu1 %v3975_v32 }
 0x11a   :  { %2624 = vmatprep.subr.bf16.mxu0 %v3980_v33  ;;  %2710 = vmatprep.subr.bf16.mxu1 %v3983_v34 }
 0x11d   :  { %2625 = vmatpush1.bf16.msra.mxu0 %v3978_v35  ;;  %2711 = vmatpush1.bf16.msra.mxu1 %v3981_v36 }
 0x11e   :  { %2626 = vmatprep.subr.bf16.mxu0 %v3986_v37  ;;  %2712 = vmatprep.subr.bf16.mxu1 %v3989_v38 }
 0x121   :  { %2627 = vmatpush1.bf16.msra.mxu0 %v3984_v39  ;;  %2713 = vmatpush1.bf16.msra.mxu1 %v3987_v40 }
 0x122   :  { %2628 = vmatprep.subr.bf16.mxu0 %v3992_v41  ;;  %2714 = vmatprep.subr.bf16.mxu1 %v3995_v42 }
 0x125   :  { %2629 = vmatpush1.bf16.msra.mxu0 %v3990_v43  ;;  %2715 = vmatpush1.bf16.msra.mxu1 %v3993_v44 }
 0x126   :  { %2630 = vmatprep.subr.bf16.mxu0 %v3998_v45  ;;  %2716 = vmatprep.subr.bf16.mxu1 %v4001_v19 }
 0x129   :  { %2631 = vmatpush1.bf16.msra.mxu0 %v3996_v20  ;;  %2717 = vmatpush1.bf16.msra.mxu1 %v3999_v21 }
 0x12a   :  { %2632 = vmatprep.subr.bf16.mxu0 %v4004_v22  ;;  %2718 = vmatprep.subr.bf16.mxu1 %v4007_v46  ;;  %v4038_v22 = vld [vmem:[#allocation5 + $0x200] ss:$16 sps:$4 sm:$0xff]   ;;  %v4041_v46 = vld [vmem:[#allocation5 + $0x208] ss:$16 sps:$4 sm:$0xff]  }
 0x12d   :  { %2633 = vmatpush1.bf16.msra.mxu0 %v4002_v47  ;;  %2719 = vmatpush1.bf16.msra.mxu1 %v4005_v49  ;;  %v4046_v47 = vld [vmem:[#allocation5 + $0x224] ss:$16 sps:$4 sm:$0xff]   ;;  %v4049_v49 = vld [vmem:[#allocation5 + $0x22c] ss:$16 sps:$4 sm:$0xff]  }
 0x12e   :  { %2634 = vmatprep.subr.bf16.mxu0 %v4010_v50  ;;  %2720 = vmatprep.subr.bf16.mxu1 %v4013_v51  ;;  %v4044_v50 = vld [vmem:[#allocation5 + $0x220] ss:$16 sps:$4 sm:$0xff]   ;;  %v4047_v51 = vld [vmem:[#allocation5 + $0x228] ss:$16 sps:$4 sm:$0xff]  }
 0x131   :  { %2635 = vmatpush1.bf16.msra.mxu0 %v4008_v52  ;;  %2721 = vmatpush1.bf16.msra.mxu1 %v4011_v55  ;;  %v4052_v52 = vld [vmem:[#allocation5 + $0x244] ss:$16 sps:$4 sm:$0xff]   ;;  %v4055_v55 = vld [vmem:[#allocation5 + $0x24c] ss:$16 sps:$4 sm:$0xff]  }
 0x132   :  { %2636 = vmatprep.subr.bf16.mxu0 %v4016_v57  ;;  %2722 = vmatprep.subr.bf16.mxu1 %v4019_v58  ;;  %v4050_v57 = vld [vmem:[#allocation5 + $0x240] ss:$16 sps:$4 sm:$0xff]   ;;  %v4053_v58 = vld [vmem:[#allocation5 + $0x248] ss:$16 sps:$4 sm:$0xff]  }
 0x135   :  { %2637 = vmatpush1.bf16.msra.mxu0 %v4014_v53  ;;  %2723 = vmatpush1.bf16.msra.mxu1 %v4017_v56  ;;  %v4058_v53 = vld [vmem:[#allocation5 + $0x264] ss:$16 sps:$4 sm:$0xff]   ;;  %v4061_v56 = vld [vmem:[#allocation5 + $0x26c] ss:$16 sps:$4 sm:$0xff]  }
 0x136   :  { %2638 = vmatprep.subr.bf16.mxu0 %v4022_v59  ;;  %2724 = vmatprep.subr.bf16.mxu1 %v4025_v60  ;;  %v4056_v59 = vld [vmem:[#allocation5 + $0x260] ss:$16 sps:$4 sm:$0xff]   ;;  %v4059_v60 = vld [vmem:[#allocation5 + $0x268] ss:$16 sps:$4 sm:$0xff]  }
 0x139   :  { %2639 = vmatpush1.bf16.msra.mxu0 %v4020_v61  ;;  %2725 = vmatpush1.bf16.msra.mxu1 %v4023_v62  ;;  %v4064_v61 = vld [vmem:[#allocation5 + $0x284] ss:$16 sps:$4 sm:$0xff]   ;;  %v4067_v62 = vld [vmem:[#allocation5 + $0x28c] ss:$16 sps:$4 sm:$0xff]  }
 0x13a   :  { %2640 = vmatprep.subr.bf16.mxu0 %v4028_v63  ;;  %2726 = vmatprep.subr.bf16.mxu1 %v4031_v0  ;;  %v4062_v63 = vld [vmem:[#allocation5 + $0x280] ss:$16 sps:$4 sm:$0xff]   ;;  %v4065_v0 = vld [vmem:[#allocation5 + $0x288] ss:$16 sps:$4 sm:$0xff]  }
 0x13d   :  { %2641 = vmatpush1.bf16.msra.mxu0 %v4026_v1  ;;  %2727 = vmatpush1.bf16.msra.mxu1 %v4029_v2  ;;  %v4070_v1 = vld [vmem:[#allocation5 + $0x2a4] ss:$16 sps:$4 sm:$0xff]   ;;  %v4073_v2 = vld [vmem:[#allocation5 + $0x2ac] ss:$16 sps:$4 sm:$0xff]  }
 0x13e   :  { %2642 = vmatprep.subr.bf16.mxu0 %v4034_v3  ;;  %2728 = vmatprep.subr.bf16.mxu1 %v4037_v4  ;;  %v4068_v3 = vld [vmem:[#allocation5 + $0x2a0] ss:$16 sps:$4 sm:$0xff]   ;;  %v4071_v4 = vld [vmem:[#allocation5 + $0x2a8] ss:$16 sps:$4 sm:$0xff]  }
 0x141   :  { %2643 = vmatpush1.bf16.msra.mxu0 %v4032_v5  ;;  %2729 = vmatpush1.bf16.msra.mxu1 %v4035_v6  ;;  %v4076_v5 = vld [vmem:[#allocation5 + $0x2c4] ss:$16 sps:$4 sm:$0xff]   ;;  %v4079_v6 = vld [vmem:[#allocation5 + $0x2cc] ss:$16 sps:$4 sm:$0xff]  }
 0x142   :  { %2655 = vmatprep.subr.bf16.mxu0 %v4040_v7  ;;  %2741 = vmatprep.subr.bf16.mxu1 %v4043_v8  ;;  %v4074_v7 = vld [vmem:[#allocation5 + $0x2c0] ss:$16 sps:$4 sm:$0xff]   ;;  %v4077_v8 = vld [vmem:[#allocation5 + $0x2c8] ss:$16 sps:$4 sm:$0xff]  }
 0x1d7   :  { %v1629_v17 = vpop.f32.mrb[0].mxu0  ;;  %v1801_v18 = vpop.f32.mrb[0].mxu1 }
 0x1d8   :  { %v3564_v23 = vadd.f32 %v1629_v17, %v465_v54  ;;  %v3568_v24 = vadd.f32 %v1801_v18, %v473_v14  ;;  %v1631_v25 = vpop.f32.mrb[1].mxu0  ;;  %v1803_v26 = vpop.f32.mrb[1].mxu1  ;;  %v4091_v17 = vld [vmem:[#allocation5 + $0x30c] ss:$16 sps:$4 sm:$0xff]   ;;  %v4086_v18 = vld [vmem:[#allocation5 + $0x300] ss:$16 sps:$4 sm:$0xff]  }
 0x1d9   :  { %v3565_v27 = vadd.f32 %v1631_v25, %v469_v15  ;;  %v3569_v28 = vadd.f32 %v1803_v26, %v477_v16  ;;  %v1633_v29 = vpop.f32.mrb[2].mxu0  ;;  %v1805_v30 = vpop.f32.mrb[2].mxu1  ;;  %v4097_v25 = vld [vmem:[#allocation5 + $0x32c] ss:$16 sps:$4 sm:$0xff]   ;;  %v4092_v26 = vld [vmem:[#allocation5 + $0x320] ss:$16 sps:$4 sm:$0xff]  }
 0x1da   :  { %v3566_v31 = vadd.f32 %v1633_v29, %v465_v54  ;;  %v3570_v32 = vadd.f32 %v1805_v30, %v473_v14  ;;  %v1635_v33 = vpop.f32.mrb[3].mxu0  ;;  %v1807_v34 = vpop.f32.mrb[3].mxu1  ;;  %v1810_v37 = vmax.f32 %v3564_v23, 0.0  ;;  %v1812_v38 = vmax.f32 %v3568_v24, 0.0  ;;  %v4085_v54 = vld [vmem:[#allocation5 + $0x2ec] ss:$16 sps:$4 sm:$0xff]  }
 0x1db   :  { %v3567_v35 = vadd.f32 %v1635_v33, %v469_v15  ;;  %v3571_v36 = vadd.f32 %v1807_v34, %v477_v16  ;;  %v1811_v41 = vmax.f32 %v3565_v27, 0.0  ;;  %v1813_v42 = vmax.f32 %v3569_v28, 0.0  ;;  %v4080_v14 = vld [vmem:[#allocation5 + $0x2e0] ss:$16 sps:$4 sm:$0xff]   ;;  %v4083_v15 = vld [vmem:[#allocation5 + $0x2e8] ss:$16 sps:$4 sm:$0xff]  }
 0x1dc   :  { %v1814_v39 = vmax.f32 %v3566_v31, 0.0  ;;  %v1816_v40 = vmax.f32 %v3570_v32, 0.0  ;;  %v4088_v16 = vld [vmem:[#allocation5 + $0x304] ss:$16 sps:$4 sm:$0xff]   ;;  %v4089_v23 = vld [vmem:[#allocation5 + $0x308] ss:$16 sps:$4 sm:$0xff]  }
 0x1dd   :  { %v1815_v43 = vmax.f32 %v3567_v35, 0.0  ;;  %v1817_v44 = vmax.f32 %v3571_v36, 0.0  ;;  %v4094_v24 = vld [vmem:[#allocation5 + $0x324] ss:$16 sps:$4 sm:$0xff]   ;;  %v4095_v27 = vld [vmem:[#allocation5 + $0x328] ss:$16 sps:$4 sm:$0xff]  }
 0x1de   :  { %v1818_v45 = vpack.c.bf16 %v1814_v39, %v1810_v37  ;;  %v4471_v19 = vpack.c.bf16 %v1816_v40, %v1812_v38  ;;  %v4100_v28 = vld [vmem:[#allocation5 + $0x344] ss:$16 sps:$4 sm:$0xff]   ;;  %v4103_v29 = vld [vmem:[#allocation5 + $0x34c] ss:$16 sps:$4 sm:$0xff]   ;;  %v4098_v30 = vld [vmem:[#allocation5 + $0x340] ss:$16 sps:$4 sm:$0xff]  }
 0x1df   :  { %v1819_v20 = vpack.c.bf16 %v1815_v43, %v1811_v41  ;;  %v1821_v21 = vpack.c.bf16 %v1817_v44, %v1813_v42  ;;  %v4101_v31 = vld [vmem:[#allocation5 + $0x348] ss:$16 sps:$4 sm:$0xff]   ;;  %v4106_v32 = vld [vmem:[#allocation5 + $0x364] ss:$16 sps:$4 sm:$0xff]   ;;  %v4109_v33 = vld [vmem:[#allocation5 + $0x36c] ss:$16 sps:$4 sm:$0xff]  }
 0x1e0   :  { %v4104_v34 = vld [vmem:[#allocation5 + $0x360] ss:$16 sps:$4 sm:$0xff]   ;;  %v4107_v35 = vld [vmem:[#allocation5 + $0x368] ss:$16 sps:$4 sm:$0xff]   ;;  %v4112_v36 = vld [vmem:[#allocation5 + $0x384] ss:$16 sps:$4 sm:$0xff]  }
 0x1e1   :  { %2644 = vmatprep.mubr.bf16.mxu0 %v1819_v20  ;;  %2730 = vmatprep.mubr.bf16.mxu1 %v1819_v20  ;;  %v4115_v37 = vld [vmem:[#allocation5 + $0x38c] ss:$16 sps:$4 sm:$0xff]   ;;  %v4110_v38 = vld [vmem:[#allocation5 + $0x380] ss:$16 sps:$4 sm:$0xff]   ;;  %v4113_v39 = vld [vmem:[#allocation5 + $0x388] ss:$16 sps:$4 sm:$0xff]  }
 0x1e2   :  { %2645 = vmatmul.mubr.bf16.vlgmr.msra.gmra.mrb[4].mxu0 %v1818_v45  ;;  %2731 = vmatmul.mubr.bf16.vlgmr.msra.gmra.mrb[4].mxu1 %v1818_v45  ;;  %v4118_v40 = vld [vmem:[#allocation5 + $0x3a4] ss:$16 sps:$4 sm:$0xff]   ;;  %v4121_v41 = vld [vmem:[#allocation5 + $0x3ac] ss:$16 sps:$4 sm:$0xff]   ;;  %v4116_v42 = vld [vmem:[#allocation5 + $0x3a0] ss:$16 sps:$4 sm:$0xff]  }
 0x1e3   :  { %2656 = vmatpush1.bf16.msra.mxu0 %v4038_v22  ;;  %2742 = vmatpush1.bf16.msra.mxu1 %v4041_v46  ;;  %v4119_v43 = vld [vmem:[#allocation5 + $0x3a8] ss:$16 sps:$4 sm:$0xff]   ;;  %v4124_v44 = vld [vmem:[#allocation5 + $0x3c4] ss:$16 sps:$4 sm:$0xff]   ;;  %v4127_v45 = vld [vmem:[#allocation5 + $0x3cc] ss:$16 sps:$4 sm:$0xff]  }
 0x1e4   :  { %2687 = vmatprep.mubr.bf16.mxu0 %v1821_v21  ;;  %2773 = vmatprep.mubr.bf16.mxu1 %v1821_v21  ;;  %v4122_v20 = vld [vmem:[#allocation5 + $0x3c0] ss:$16 sps:$4 sm:$0xff]   ;;  %v4125_v21 = vld [vmem:[#allocation5 + $0x3c8] ss:$16 sps:$4 sm:$0xff]   ;;  %v4130_v22 = vld [vmem:[#allocation5 + $0x3e4] ss:$16 sps:$4 sm:$0xff]  }
 0x1e5   :  { %2657 = vmatprep.subr.bf16.mxu0 %v4046_v47  ;;  %2743 = vmatprep.subr.bf16.mxu1 %v4049_v49  ;;  %v4133_v46 = vld [vmem:[#allocation5 + $0x3ec] ss:$16 sps:$4 sm:$0xff]   ;;  %v4128_v47 = vld [vmem:[#allocation5 + $0x3e0] ss:$16 sps:$4 sm:$0xff]   ;;  %v4131_v49 = vld [vmem:[#allocation5 + $0x3e8] ss:$16 sps:$4 sm:$0xff]  }
 0x1e7   :  { %2658 = vmatpush1.bf16.msra.mxu0 %v4044_v50  ;;  %2744 = vmatpush1.bf16.msra.mxu1 %v4047_v51  ;;  %v4134_v50 = vld [vmem:[#allocation7 + $0x40] sm:$0xff]  }
 0x1e8   :  { %2659 = vmatprep.subr.bf16.mxu0 %v4052_v52  ;;  %2745 = vmatprep.subr.bf16.mxu1 %v4055_v55  ;;  %v4135_v51 = vld [vmem:[#allocation7 + $0xc0] sm:$0xff]  }
 0x1e9   :  { %v4136_v52 = vld [vmem:[#allocation7] sm:$0xff]  }
 0x1ea   :  { %v4137_v55 = vld [vmem:[#allocation7 + $0x80] sm:$0xff]  }
 0x1eb   :  { %2660 = vmatpush1.bf16.msra.mxu0 %v4050_v57  ;;  %2746 = vmatpush1.bf16.msra.mxu1 %v4053_v58  ;;  %v4138_v57 = vld [vmem:[#allocation7 + $0x48] sm:$0xff]  }
 0x1ec   :  { %2661 = vmatprep.subr.bf16.mxu0 %v4058_v53  ;;  %2747 = vmatprep.subr.bf16.mxu1 %v4061_v56  ;;  %v4139_v58 = vld [vmem:[#allocation7 + $0xc8] sm:$0xff]  }
 0x1ed   :  { %v4140_v53 = vld [vmem:[#allocation7 + $0x8] sm:$0xff]  }
 0x1ee   :  { %v4141_v56 = vld [vmem:[#allocation7 + $0x88] sm:$0xff]  }
 0x1ef   :  { %2662 = vmatpush1.bf16.msra.mxu0 %v4056_v59  ;;  %2748 = vmatpush1.bf16.msra.mxu1 %v4059_v60  ;;  %v4142_v59 = vld [vmem:[#allocation7 + $0x50] sm:$0xff]  }
 0x1f0   :  { %2663 = vmatprep.subr.bf16.mxu0 %v4064_v61  ;;  %2749 = vmatprep.subr.bf16.mxu1 %v4067_v62  ;;  %v4143_v60 = vld [vmem:[#allocation7 + $0xd0] sm:$0xff]  }
 0x1f1   :  { %v4144_v61 = vld [vmem:[#allocation7 + $0x10] sm:$0xff]  }
 0x1f2   :  { %v4145_v62 = vld [vmem:[#allocation7 + $0x90] sm:$0xff]  }
 0x1f3   :  { %2664 = vmatpush1.bf16.msra.mxu0 %v4062_v63  ;;  %2750 = vmatpush1.bf16.msra.mxu1 %v4065_v0  ;;  %v4146_v63 = vld [vmem:[#allocation7 + $0x58] sm:$0xff]  }
 0x1f4   :  { %2665 = vmatprep.subr.bf16.mxu0 %v4070_v1  ;;  %2751 = vmatprep.subr.bf16.mxu1 %v4073_v2  ;;  %v4147_v0 = vld [vmem:[#allocation7 + $0xd8] sm:$0xff]   ;;  %v4150_v2 = vld [vmem:[#allocation7 + $0x60] sm:$0xff]  }
 0x1f5   :  { %v4148_v1 = vld [vmem:[#allocation7 + $0x18] sm:$0xff]  }
 0x1f7   :  { %2666 = vmatpush1.bf16.msra.mxu0 %v4068_v3  ;;  %2752 = vmatpush1.bf16.msra.mxu1 %v4071_v4  ;;  %v4151_v3 = vld [vmem:[#allocation7 + $0xe0] sm:$0xff]  }
 0x1f8   :  { %2667 = vmatprep.subr.bf16.mxu0 %v4076_v5  ;;  %2753 = vmatprep.subr.bf16.mxu1 %v4079_v6  ;;  %v4152_v4 = vld [vmem:[#allocation7 + $0x20] sm:$0xff]   ;;  %v4154_v6 = vld [vmem:[#allocation7 + $0x68] sm:$0xff]  }
 0x1f9   :  { %v4153_v5 = vld [vmem:[#allocation7 + $0xa0] sm:$0xff]  }
 0x1fb   :  { %2668 = vmatpush1.bf16.msra.mxu0 %v4074_v7  ;;  %2754 = vmatpush1.bf16.msra.mxu1 %v4077_v8  ;;  %v4155_v7 = vld [vmem:[#allocation7 + $0xe8] sm:$0xff]  }
 0x1fc   :  { %2669 = vmatprep.subr.bf16.mxu0 %v4082_v11  ;;  %2755 = vmatprep.subr.bf16.mxu1 %v4085_v54  ;;  %v4156_v8 = vld [vmem:[#allocation7 + $0x28] sm:$0xff]   ;;  %v4158_v54 = vld [vmem:[#allocation7 + $0x70] sm:$0xff]  }
 0x1fd   :  { %v4157_v11 = vld [vmem:[#allocation7 + $0xa8] sm:$0xff]  }
 0x1ff   :  { %2670 = vmatpush1.bf16.msra.mxu0 %v4080_v14  ;;  %2756 = vmatpush1.bf16.msra.mxu1 %v4083_v15  ;;  %v4159_v14 = vld [vmem:[#allocation7 + $0xf0] sm:$0xff]  }
 0x200   :  { %2671 = vmatprep.subr.bf16.mxu0 %v4088_v16  ;;  %2757 = vmatprep.subr.bf16.mxu1 %v4091_v17  ;;  %v4160_v15 = vld [vmem:[#allocation7 + $0x30] sm:$0xff]   ;;  %v4162_v17 = vld [vmem:[#allocation7 + $0x78] sm:$0xff]  }
 0x201   :  { %v4161_v16 = vld [vmem:[#allocation7 + $0xb0] sm:$0xff]  }
 0x203   :  { %2672 = vmatpush1.bf16.msra.mxu0 %v4086_v18  ;;  %2758 = vmatpush1.bf16.msra.mxu1 %v4089_v23  ;;  %v4163_v18 = vld [vmem:[#allocation7 + $0xf8] sm:$0xff]  }
 0x204   :  { %2673 = vmatprep.subr.bf16.mxu0 %v4094_v24  ;;  %2759 = vmatprep.subr.bf16.mxu1 %v4097_v25  ;;  %v4164_v23 = vld [vmem:[#allocation7 + $0x38] sm:$0xff]   ;;  %v1950_v25 = vld [vmem:[%s4505_s4] sm:$0xf] }
 0x205   :  { %v4165_v24 = vld [vmem:[#allocation7 + $0xb8] sm:$0xff]  }
 0x207   :  { %2674 = vmatpush1.bf16.msra.mxu0 %v4092_v26  ;;  %2760 = vmatpush1.bf16.msra.mxu1 %v4095_v27  ;;  %v1955_v26 = vrot.slane %v1950_v25, %v464_v9  ;;  %v1963_v27 = vrot.slane %v1950_v25, %v472_v10 }
 0x208   :  { %2675 = vmatprep.subr.bf16.mxu0 %v4100_v28  ;;  %2761 = vmatprep.subr.bf16.mxu1 %v4103_v29  ;;  %v1959_v28 = vrot.slane %v1950_v25, %v468_v12  ;;  %v1967_v29 = vrot.slane %v1950_v25, %v476_v13 }
 0x20b   :  { %2676 = vmatpush1.bf16.msra.mxu0 %v4098_v30  ;;  %2762 = vmatpush1.bf16.msra.mxu1 %v4101_v31 }
 0x20c   :  { %2677 = vmatprep.subr.bf16.mxu0 %v4106_v32  ;;  %2763 = vmatprep.subr.bf16.mxu1 %v4109_v33 }
 0x20f   :  { %2678 = vmatpush1.bf16.msra.mxu0 %v4104_v34  ;;  %2764 = vmatpush1.bf16.msra.mxu1 %v4107_v35 }
 0x210   :  { %2679 = vmatprep.subr.bf16.mxu0 %v4112_v36  ;;  %2765 = vmatprep.subr.bf16.mxu1 %v4115_v37 }
 0x213   :  { %2680 = vmatpush1.bf16.msra.mxu0 %v4110_v38  ;;  %2766 = vmatpush1.bf16.msra.mxu1 %v4113_v39 }
 0x214   :  { %2681 = vmatprep.subr.bf16.mxu0 %v4118_v40  ;;  %2767 = vmatprep.subr.bf16.mxu1 %v4121_v41 }
 0x217   :  { %2682 = vmatpush1.bf16.msra.mxu0 %v4116_v42  ;;  %2768 = vmatpush1.bf16.msra.mxu1 %v4119_v43 }
 0x218   :  { %2683 = vmatprep.subr.bf16.mxu0 %v4124_v44  ;;  %2769 = vmatprep.subr.bf16.mxu1 %v4127_v45 }
 0x21b   :  { %2684 = vmatpush1.bf16.msra.mxu0 %v4122_v20  ;;  %2770 = vmatpush1.bf16.msra.mxu1 %v4125_v21 }
 0x21c   :  { %2685 = vmatprep.subr.bf16.mxu0 %v4130_v22  ;;  %2771 = vmatprep.subr.bf16.mxu1 %v4133_v46 }
 0x21f   :  { %2686 = vmatpush1.bf16.msra.mxu0 %v4128_v47  ;;  %2772 = vmatpush1.bf16.msra.mxu1 %v4131_v49 }
 0x220   :  { %3520 = vmatprep.subr.bf16.mxu0 %v4134_v50  ;;  %3542 = vmatprep.subr.bf16.mxu1 %v4135_v51 }
 0x222   :  { %2688 = vmatmul.mubr.bf16.vlgmr.msra.gmra.mrb[4].mxu0 %v4471_v19  ;;  %2774 = vmatmul.mubr.bf16.vlgmr.msra.gmra.mrb[4].mxu1 %v4471_v19  ;;  %v4149_v19 = vld [vmem:[#allocation7 + $0x98] sm:$0xff]  }
 0x223   :  { %3521 = vmatpush3.bf16.msra.mxu0 %v4136_v52  ;;  %3543 = vmatpush3.bf16.msra.mxu1 %v4137_v55  ;;  %v3487_v55 = vld [vmem:[%s4507_s6] ss:$0 sm:$0xff] }
 0x224   :  { %3522 = vmatprep.subr.bf16.mxu0 %v4138_v57  ;;  %3544 = vmatprep.subr.bf16.mxu1 %v4139_v58 }
 0x227   :  { %3523 = vmatpush3.bf16.msra.mxu0 %v4140_v53  ;;  %3545 = vmatpush3.bf16.msra.mxu1 %v4141_v56 }
 0x228   :  { %3524 = vmatprep.subr.bf16.mxu0 %v4142_v59  ;;  %3546 = vmatprep.subr.bf16.mxu1 %v4143_v60 }
 0x22b   :  { %3525 = vmatpush3.bf16.msra.mxu0 %v4144_v61  ;;  %3547 = vmatpush3.bf16.msra.mxu1 %v4145_v62 }
 0x22c   :  { %3526 = vmatprep.subr.bf16.mxu0 %v4146_v63  ;;  %3548 = vmatprep.subr.bf16.mxu1 %v4147_v0 }
 0x22f   :  { %3527 = vmatpush3.bf16.msra.mxu0 %v4148_v1  ;;  %3549 = vmatpush3.bf16.msra.mxu1 %v4149_v19 }
 0x230   :  { %3528 = vmatprep.subr.bf16.mxu0 %v4150_v2  ;;  %3550 = vmatprep.subr.bf16.mxu1 %v4151_v3 }
 0x233   :  { %3529 = vmatpush3.bf16.msra.mxu0 %v4152_v4  ;;  %3551 = vmatpush3.bf16.msra.mxu1 %v4153_v5 }
 0x234   :  { %3530 = vmatprep.subr.bf16.mxu0 %v4154_v6  ;;  %3552 = vmatprep.subr.bf16.mxu1 %v4155_v7 }
 0x237   :  { %3531 = vmatpush3.bf16.msra.mxu0 %v4156_v8  ;;  %3553 = vmatpush3.bf16.msra.mxu1 %v4157_v11 }
 0x238   :  { %3532 = vmatprep.subr.bf16.mxu0 %v4158_v54  ;;  %3554 = vmatprep.subr.bf16.mxu1 %v4159_v14 }
 0x23b   :  { %3533 = vmatpush3.bf16.msra.mxu0 %v4160_v15  ;;  %3555 = vmatpush3.bf16.msra.mxu1 %v4161_v16 }
 0x23c   :  { %3534 = vmatprep.subr.bf16.mxu0 %v4162_v17  ;;  %3556 = vmatprep.subr.bf16.mxu1 %v4163_v18 }
 0x23f   :  { %3535 = vmatpush3.bf16.msra.mxu0 %v4164_v23  ;;  %3557 = vmatpush3.bf16.msra.mxu1 %v4165_v24 }
 0x2f5   :  { %v2689_v30 = vpop.f32.mrb[4].mxu0  ;;  %v2775_v31 = vpop.f32.mrb[4].mxu1 }
 0x2f6   :  { %v3572_v32 = vadd.f32 %v2689_v30, %v1955_v26  ;;  %v3576_v33 = vadd.f32 %v2775_v31, %v1963_v27  ;;  %v2691_v34 = vpop.f32.mrb[5].mxu0  ;;  %v2777_v35 = vpop.f32.mrb[5].mxu1 }
 0x2f7   :  { %v3573_v36 = vadd.f32 %v2691_v34, %v1959_v28  ;;  %v3577_v37 = vadd.f32 %v2777_v35, %v1967_v29  ;;  %v2693_v38 = vpop.f32.mrb[6].mxu0  ;;  %v2779_v39 = vpop.f32.mrb[6].mxu1 }
 0x2f8   :  { %v3574_v9 = vadd.f32 %v2693_v38, %v1955_v26  ;;  %v3578_v40 = vadd.f32 %v2779_v39, %v1963_v27  ;;  %v2695_v41 = vpop.f32.mrb[7].mxu0  ;;  %v2781_v10 = vpop.f32.mrb[7].mxu1  ;;  %v2784_v12 = vmax.f32 %v3572_v32, 0.0  ;;  %v2786_v44 = vmax.f32 %v3576_v33, 0.0 }
 0x2f9   :  { %v3575_v42 = vadd.f32 %v2695_v41, %v1959_v28  ;;  %v3579_v43 = vadd.f32 %v2781_v10, %v1967_v29  ;;  %v2785_v45 = vmax.f32 %v3573_v36, 0.0  ;;  %v2787_v20 = vmax.f32 %v3577_v37, 0.0 }
 0x2fa   :  { %v2788_v48 = vmax.f32 %v3574_v9, 0.0  ;;  %v2790_v13 = vmax.f32 %v3578_v40, 0.0 }
 0x2fb   :  { %v2789_v21 = vmax.f32 %v3575_v42, 0.0  ;;  %v2791_v22 = vmax.f32 %v3579_v43, 0.0 }
 0x2fc   :  { %v2792_v46 = vpack.c.bf16 %v2788_v48, %v2784_v12  ;;  %v2794_v47 = vpack.c.bf16 %v2790_v13, %v2786_v44 }
 0x2fd   :  { %v2793_v49 = vpack.c.bf16 %v2789_v21, %v2785_v45  ;;  %v2795_v50 = vpack.c.bf16 %v2791_v22, %v2787_v20 }
 0x2ff   :  { %3091 = vmatprep.mubr.bf16.mxu0 %v2793_v49  ;;  %3132 = vmatprep.mubr.bf16.mxu1 %v2795_v50 }
 0x300   :  { %3092 = vmatmul.mubr.bf16.vlgmr.msra.gmra.mrb[8].mxu0 %v2792_v46  ;;  %3133 = vmatmul.mubr.bf16.vlgmr.msra.gmra.mrb[8].mxu1 %v2794_v47 }
 0x3d3   :  { %v3536_v51 = vpop.f32.mrb[8].mxu0  ;;  %v3558_v52 = vpop.f32.mrb[8].mxu1 }
 0x3d4   :  { %v3537_v57 = vpop.f32.mrb[9].mxu0  ;;  %v3559_v58 = vpop.f32.mrb[9].mxu1 }
 0x3d5   :  { %v3538_v53 = vadd.f32 %v3537_v57, %v3536_v51  ;;  %v3560_v56 = vadd.f32 %v3559_v58, %v3558_v52  ;;  %v3539_v59 = vpop.f32.mrb[10].mxu0  ;;  %v3561_v60 = vpop.f32.mrb[10].mxu1 }
 0x3d6   :  { %v3540_v61 = vpop.f32.mrb[11].mxu0  ;;  %v3562_v62 = vpop.f32.mrb[11].mxu1 }
 0x3d7   :  { %v3094_v63 = vadd.f32 %v3538_v53, %v3487_v55  ;;  %v3541_v0 = vadd.f32 %v3540_v61, %v3539_v59  ;;  %v3563_v1 = vadd.f32 %v3562_v62, %v3561_v60 }
 0x3d9   :  { %v3135_v19 = vadd.f32 %v3560_v56, %v3094_v63  ;;  %v3097_v2 = vadd.f32 %v3541_v0, %v3487_v55 }
 0x3db   :  { %3141 = vst [vmem:[#allocation8] sm:$0xff] %v3135_v19  ;;  %v3138_v3 = vadd.f32 %v3563_v1, %v3097_v2 }
 0x3dd   :  { %3142 = vst [vmem:[#allocation8 + $0x8] sm:$0xff] %v3138_v3 }
 0x3de   :  { %3147 = vsyncadd [#allocation4], 224  ;;  %s4269_s24 = smov [#allocation8]  }
 0x3df   :  { %s3148_s3 = sshll.u32 %s4269_s24, 4  ;;  %s3149_s3 = int_to_ptr.vmem [resolvable:$true] %s3148_s3 }
 0x3e0   :  { %s4232_s6 = scalar_lea.vmem %s3149_s3, 32  ;;  %s4236_s25 = scalar_lea.vmem %s3149_s3, 256 }
 0x3e1   :  { %p4233_p10 = scmp.ne.s32.totalorder %s3149_s3, %s4232_s6  ;;  %p4237_p11 = scmp.lt.s32.totalorder %s3149_s3, %s3149_s3 }
 0x3e2   :  { %p4238_p12 = scmp.lt.s32.totalorder %s4236_s25, %s4232_s6 }
 0x3e4   :  { %p4239_p13 = por %p4238_p12, %p4237_p11 }
 0x3e6   :  { %p4240_p0 = pnand %p4239_p13, %p4233_p10 }
 0x3e8   :  { %4243 = shalt.err (!%p4240_p0)
}
 0x3e9   :  { %s4244_s29 = scalar_lea.hbm %s4508_s7, 32 }
 0x3ea   :  { %p4245_p1 = scmp.ne.s32.totalorder %s4508_s7, %s4244_s29  ;;  %p4248_p2 = scmp.lt.u32.totalorder %s4244_s29, %s4508_s7 }
 0x3ec   :  { %p4250_p3 = pnand %p4248_p2, %p4245_p1 }
 0x3ee   :  { %4253 = shalt.err (!%p4250_p3)
}
 0x3ef   :  { %s4270_s11 = smov 32   ;;  %s4271_s12 = smov 2  }
 0x3f0   :  { %3154 = dma.vmem_to_hbm [thread:$0]  %s3149_s3, 32, %s4508_s7, [#allocation4], %s4270_s11, %s4270_s11, %s4271_s12  }
 0x3f1   :  { %4258 = dma.done.wait [#allocation4], 256  }
 0x3f2   :  { %4259 = vsyncadd [#allocation4], 4294967040 }
 0x3f3   :  { %3158 = vsyncpa [#allocation3], 1 }
 0x3f4   :  { %3159 = vsyncpa [#allocation6], 1 }
 0x3f5   :  { %3160 = vsyncpa [#allocation4], 1 }

</bundles_post_ra>
